<compile_context>
chip_gen: v6e
topology: v6e:2x2x1
jax: 0.10.0
libtpu: 0.0.40
codegen_flags: <defaults>
</compile_context>

<pallas_src>
import functools

import jax
import jax.numpy as jnp
from jax import lax
from jax.experimental import pallas as pl
from jax.experimental.pallas import tpu as pltpu


# ----------------------------------------------------------------------------
# Fused Pallas kernel: conv1(4x4/s2) -> LReLU -> conv2(3x3) -> LReLU -> conv3(3x3)
# One grid step == one batch element; intermediates never leave VMEM.
# ----------------------------------------------------------------------------
def _dispnet_fused_kernel(y_ref, w1_ref, b1_ref, w2_ref, b2_ref, w3_ref, b3_ref,
                          out_ref, h1p_ref, h2p_ref, *, neg_slope):
    f32 = jnp.float32
    OH, OW = out_ref.shape[1], out_ref.shape[2]

    def leaky(x):
        return jnp.where(x >= 0.0, x, neg_slope * x)

    # ---- layer 1: stride-2 4x4 conv == stride-1 2x2 conv on space-to-depth input
    k1 = w1_ref.shape[1]                                    # 4 * 2C
    acc1 = None
    for qy in range(2):
        for qx in range(2):
            xs = y_ref[0, qy:qy + OH, qx:qx + OW, :]        # (OH, OW, 4*2C) bf16
            xs = xs.reshape(OH * OW, k1)
            d = jnp.dot(xs, w1_ref[2 * qy + qx], preferred_element_type=f32)
            acc1 = d if acc1 is None else acc1 + d
    h1 = leaky(acc1 + b1_ref[...])                          # (OH*OW, ndf) f32
    # Zero-padded bf16 activation slab (border zeros realize the p=1 padding).
    h1p_ref[...] = jnp.zeros_like(h1p_ref)
    h1p_ref[1:OH + 1, 1:OW + 1, :] = h1.reshape(OH, OW, -1).astype(h1p_ref.dtype)

    # ---- layer 2: 3x3 / s1 / p1 conv, ndf -> 2*ndf
    k2 = w2_ref.shape[1]                                    # ndf
    acc2 = None
    for ky in range(3):
        for kx in range(3):
            xs = h1p_ref[ky:ky + OH, kx:kx + OW, :]         # (OH, OW, ndf) bf16
            xs = xs.reshape(OH * OW, k2)
            d = jnp.dot(xs, w2_ref[3 * ky + kx], preferred_element_type=f32)
            acc2 = d if acc2 is None else acc2 + d
    h2 = leaky(acc2 + b2_ref[...])                          # (OH*OW, 2ndf) f32
    h2p_ref[...] = jnp.zeros_like(h2p_ref)
    h2p_ref[1:OH + 1, 1:OW + 1, :] = h2.reshape(OH, OW, -1)

    # ---- layer 3: 3x3 / s1 / p1 conv, 2*ndf -> 1 (disparity).
    # OC=1: computed as per-tap broadcast-multiply + channel reduce on the VPU so
    # the result is a dense (OH, OW) tile rather than a single-lane (M, 1) matmul.
    acc3 = None
    for ky in range(3):
        for kx in range(3):
            t = h2p_ref[ky:ky + OH, kx:kx + OW, :] * w3_ref[3 * ky + kx]
            acc3 = t if acc3 is None else acc3 + t          # (OH, OW, 2ndf) f32
    disp = jnp.sum(acc3, axis=-1) + b3_ref[...]             # (OH, OW) + (1, 1)
    out_ref[0] = disp.astype(out_ref.dtype)


# ----------------------------------------------------------------------------
# Wrapper: one fused pallas_call per per-domain DispNet forward
# ----------------------------------------------------------------------------
def dispnet_forward_fused(params, left, right):
    """One per-domain DispNet forward.  left/right: (N, C, H, W) float32."""
    N, C, H, W = left.shape
    assert right.shape == left.shape
    assert H % 2 == 0 and W % 2 == 0, "even spatial dims expected"
    OH, OW = H // 2, W // 2
    BH, BW = OH + 1, OW + 1
    C2 = 2 * C

    # Concat stereo pair on channels, go NHWC, zero-pad (p=1), space-to-depth(2).
    # Pure layout transform of the input (no im2col amplification); the stride-2
    # 4x4 conv becomes a stride-1 2x2 conv inside the kernel.  XLA fuses the whole
    # chain into a single pass producing the bf16 `y` slab.
    x = jnp.concatenate([left, right], axis=1).transpose(0, 2, 3, 1)   # (N,H,W,2C)
    xp = jnp.pad(x, ((0, 0), (1, 1), (1, 1), (0, 0)))                  # (N,H+2,W+2,2C)
    y = xp.reshape(N, BH, 2, BW, 2, C2).transpose(0, 1, 3, 2, 4, 5)
    y = y.reshape(N, BH, BW, 4 * C2).astype(jnp.bfloat16)

    ndf = params["w1e"].shape[-1]
    kernel = functools.partial(_dispnet_fused_kernel, neg_slope=0.1)

    # TODO(synk): for large H/W, add spatial (halo) tiling; here one grid step
    # holds a whole (small) image in VMEM.
    out = pl.pallas_call(
        kernel,
        out_shape=jax.ShapeDtypeStruct((N, OH, OW), jnp.float32),
        grid=(N,),
        in_specs=[
            pl.BlockSpec((1, BH, BW, 4 * C2), lambda n: (n, 0, 0, 0)),  # s2d input
            pl.BlockSpec((4, 4 * C2, ndf), lambda n: (0, 0, 0)),        # w1 (bf16)
            pl.BlockSpec((1, ndf), lambda n: (0, 0)),                   # b1 (f32)
            pl.BlockSpec((9, ndf, 2 * ndf), lambda n: (0, 0, 0)),       # w2 (bf16)
            pl.BlockSpec((1, 2 * ndf), lambda n: (0, 0)),               # b2 (f32)
            pl.BlockSpec((9, 1, 2 * ndf), lambda n: (0, 0, 0)),         # w3 (f32)
            pl.BlockSpec((1, 1), lambda n: (0, 0)),                     # b3 (f32)
        ],
        out_specs=pl.BlockSpec((1, OH, OW), lambda n: (n, 0, 0)),
        scratch_shapes=[
            pltpu.VMEM((OH + 2, OW + 2, ndf), jnp.bfloat16),     # zero-padded h1 (MXU operand)
            pltpu.VMEM((OH + 2, OW + 2, 2 * ndf), jnp.float32),  # zero-padded h2 (VPU operand)
        ],
        compiler_params=pltpu.CompilerParams(
            dimension_semantics=("parallel",)),
    )(y, params["w1e"], params["b1e"], params["w2e"], params["b2e"],
      params["w3e"], params["b3e"])

    # (N, OH, OW) -> NCHW disparity map (N, 1, OH, OW)
    return out.reshape(N, 1, OH, OW)


# ----------------------------------------------------------------------------
# Parameter init (DCGAN-style) + precomputed kernel-ready weight slabs
# ----------------------------------------------------------------------------
def init_dispnet_params(key, in_ch, ndf):
    c2 = 2 * in_ch
    k1, k2, k3 = jax.random.split(key, 3)

    w1 = 0.02 * jax.random.normal(k1, (ndf, c2, 4, 4), dtype=jnp.float32)
    w2 = 0.02 * jax.random.normal(k2, (2 * ndf, ndf, 3, 3), dtype=jnp.float32)
    w3 = 0.02 * jax.random.normal(k3, (1, 2 * ndf, 3, 3), dtype=jnp.float32)
    b1 = jnp.zeros((ndf,), jnp.float32)
    b2 = jnp.zeros((2 * ndf,), jnp.float32)
    b3 = jnp.zeros((1,), jnp.float32)

    # conv1: 4x4/s2 weight -> 2x2/s1 weight over the space-to-depth input:
    #   w1e[2*qy+qx, (dy, dx, c), oc] = w1[oc, c, 2*qy+dy, 2*qx+dx]
    w1e = (w1.reshape(ndf, c2, 2, 2, 2, 2)     # (oc, c, qy, dy, qx, dx)
             .transpose(2, 4, 3, 5, 1, 0)      # (qy, qx, dy, dx, c, oc)
             .reshape(4, 4 * c2, ndf)
             .astype(jnp.bfloat16))
    # conv2: per-kernel-position (IC, OC) bf16 matrices (MXU operands).
    w2e = (w2.transpose(2, 3, 1, 0)            # (ky, kx, ic, oc)
             .reshape(9, ndf, 2 * ndf).astype(jnp.bfloat16))
    # conv3 (OC=1): per-kernel-position f32 rows, consumed by the VPU epilogue.
    w3e = (w3.transpose(2, 3, 0, 1)            # (ky, kx, oc=1, ic)
             .reshape(9, 1, 2 * ndf).astype(jnp.float32))

    return {
        "w1": w1, "b1": b1, "w2": w2, "b2": b2, "w3": w3, "b3": b3,
        "w1e": w1e, "b1e": b1.reshape(1, ndf),
        "w2e": w2e, "b2e": b2.reshape(1, 2 * ndf),
        "w3e": w3e, "b3e": b3.reshape(1, 1),
    }


# ----------------------------------------------------------------------------
# Pure-JAX f32 reference (same network) for correctness checking
# ----------------------------------------------------------------------------
def _leaky(x, s=0.1):
    return jnp.where(x >= 0.0, x, s * x)


def dispnet_forward_reference(params, left, right):
    dn = ("NCHW", "OIHW", "NCHW")
    hp = lax.Precision.HIGHEST
    x = jnp.concatenate([left, right], axis=1)
    h = lax.conv_general_dilated(x, params["w1"], (2, 2), ((1, 1), (1, 1)),
                                 dimension_numbers=dn, precision=hp)
    h = _leaky(h + params["b1"][None, :, None, None])
    h = lax.conv_general_dilated(h, params["w2"], (1, 1), ((1, 1), (1, 1)),
                                 dimension_numbers=dn, precision=hp)
    h = _leaky(h + params["b2"][None, :, None, None])
    h = lax.conv_general_dilated(h, params["w3"], (1, 1), ((1, 1), (1, 1)),
                                 dimension_numbers=dn, precision=hp)
    return h + params["b3"][None, :, None, None]


# ----------------------------------------------------------------------------
# DispNet_Plexer equivalent
# ----------------------------------------------------------------------------
class DispNetPlexerPallas:
    """JAX/Pallas port of DispNet_Plexer: n_domains independent DispNets.

    forward(left, right, domain) dispatches to networks[domain](left, right),
    exactly like the PyTorch module.
    """

    def __init__(self, n_domains, in_ch, ndf, seed=0):
        keys = jax.random.split(jax.random.PRNGKey(seed), n_domains)
        self.networks = [init_dispnet_params(k, in_ch, ndf) for k in keys]
        self._fwd = jax.jit(dispnet_forward_fused)

    def forward(self, left, right, domain):
        return self._fwd(self.networks[domain], left, right)

    def __repr__(self):
        t = self.networks[0]
        n = sum(int(t[k].size) for k in ("w1", "b1", "w2", "b2", "w3", "b3"))
        return ("DispNetPlexerPallas: created %d DispNets, %d parameters each"
                % (len(self.networks), n))

    # TODO(synk): init_optimizers / zero_grads / step_grads / update_lr /
    # save / load / train-eval toggles are training & IO plumbing with no
    # Pallas equivalent and are intentionally omitted.


if __name__ == "__main__":
    N, C, H, W = 2, 4, 16, 16
    kl, kr = jax.random.split(jax.random.PRNGKey(0))
    left = jax.random.normal(kl, (N, C, H, W), dtype=jnp.float32)
    right = jax.random.normal(kr, (N, C, H, W), dtype=jnp.float32)

    plexer = DispNetPlexerPallas(n_domains=2, in_ch=C, ndf=8, seed=0)

    out0 = plexer.forward(left, right, domain=0)
    out1 = plexer.forward(left, right, domain=1)
    jax.block_until_ready(out0)
    jax.block_until_ready(out1)

    # 16x16 input -> half-resolution single-channel disparity map.
    assert out0.shape == (N, 1, H // 2, W // 2), out0.shape
    assert out1.shape == (N, 1, H // 2, W // 2), out1.shape

    # bf16-operand fused kernel vs f32 pure-JAX reference of the same network.
    ref0 = dispnet_forward_reference(plexer.networks[0], left, right)
    err = float(jnp.max(jnp.abs(out0 - ref0)))
    assert err < 5e-2, f"max abs err vs reference: {err}"

    # Independent per-domain parameters -> different outputs.
    assert float(jnp.max(jnp.abs(out0 - out1))) > 1e-6

    print("KERNEL_OK")
</pallas_src>

<mosaic_0001>
module attributes {stable_mosaic.version = 11 : i64} {
  func.func @_dispnet_fused_kernel(%arg0: i32, %arg1: memref<1x9x9x32xbf16, #tpu.memory_space<vmem>>, %arg2: memref<4x32x8xbf16, #tpu.memory_space<vmem>>, %arg3: memref<1x8xf32, #tpu.memory_space<vmem>>, %arg4: memref<9x8x16xbf16, #tpu.memory_space<vmem>>, %arg5: memref<1x16xf32, #tpu.memory_space<vmem>>, %arg6: memref<9x1x16xf32, #tpu.memory_space<vmem>>, %arg7: memref<1x1xf32, #tpu.memory_space<vmem>>, %arg8: memref<1x8x8xf32, #tpu.memory_space<vmem>>, %arg9: memref<10x10x8xbf16, #tpu.memory_space<vmem>>, %arg10: memref<10x10x16xf32, #tpu.memory_space<vmem>>) attributes {dimension_semantics = [#tpu.dimension_semantics<parallel>], iteration_bounds = array<i64: 2>, scalar_prefetch = 0 : i64, scratch_operands = 2 : i64, tpu.core_type = #tpu.core_type<tc>, window_params = [{transform_indices = @transform_0, window_bounds = array<i64: 1, 9, 9, 32>}, {pipeline_mode = #tpu.pipeline_mode<synchronous>, transform_indices = @transform_1, window_bounds = array<i64: 4, 32, 8>}, {pipeline_mode = #tpu.pipeline_mode<synchronous>, transform_indices = @transform_2, window_bounds = array<i64: 1, 8>}, {pipeline_mode = #tpu.pipeline_mode<synchronous>, transform_indices = @transform_3, window_bounds = array<i64: 9, 8, 16>}, {pipeline_mode = #tpu.pipeline_mode<synchronous>, transform_indices = @transform_4, window_bounds = array<i64: 1, 16>}, {pipeline_mode = #tpu.pipeline_mode<synchronous>, transform_indices = @transform_5, window_bounds = array<i64: 9, 1, 16>}, {pipeline_mode = #tpu.pipeline_mode<synchronous>, transform_indices = @transform_6, window_bounds = array<i64: 1, 1>}, {transform_indices = @transform_7, window_bounds = array<i64: 1, 8, 8>}]} {
    %c0 = arith.constant 0 : index
    %c0_0 = arith.constant 0 : index
    %c0_1 = arith.constant 0 : index
    %c0_2 = arith.constant 0 : index
    %0 = vector.load %arg1[%c0, %c0_0, %c0_1, %c0_2] : memref<1x9x9x32xbf16, #tpu.memory_space<vmem>>, vector<1x8x8x32xbf16>
    %1 = vector.shape_cast %0 : vector<1x8x8x32xbf16> to vector<8x8x32xbf16>
    %2 = vector.shape_cast %1 : vector<8x8x32xbf16> to vector<64x32xbf16>
    %c0_3 = arith.constant 0 : index
    %c0_4 = arith.constant 0 : index
    %c0_5 = arith.constant 0 : index
    %3 = vector.load %arg2[%c0_3, %c0_4, %c0_5] : memref<4x32x8xbf16, #tpu.memory_space<vmem>>, vector<1x32x8xbf16>
    %4 = vector.shape_cast %3 : vector<1x32x8xbf16> to vector<32x8xbf16>
    %cst = arith.constant dense<0.000000e+00> : vector<64x8xf32>
    %5 = tpu.matmul %2, %4, %cst {dimension_numbers = #tpu.dot_dimension_numbers<[1], [0], [0], [1], [0, 0, 1, 1], [], []>} : vector<64x32xbf16>, vector<32x8xbf16>, vector<64x8xf32> -> vector<64x8xf32>
    %c0_6 = arith.constant 0 : index
    %c0_7 = arith.constant 0 : index
    %c1 = arith.constant 1 : index
    %c0_8 = arith.constant 0 : index
    %6 = vector.load %arg1[%c0_6, %c0_7, %c1, %c0_8] : memref<1x9x9x32xbf16, #tpu.memory_space<vmem>>, vector<1x8x8x32xbf16>
    %7 = vector.shape_cast %6 : vector<1x8x8x32xbf16> to vector<8x8x32xbf16>
    %8 = vector.shape_cast %7 : vector<8x8x32xbf16> to vector<64x32xbf16>
    %c1_9 = arith.constant 1 : index
    %c0_10 = arith.constant 0 : index
    %c0_11 = arith.constant 0 : index
    %9 = vector.load %arg2[%c1_9, %c0_10, %c0_11] : memref<4x32x8xbf16, #tpu.memory_space<vmem>>, vector<1x32x8xbf16>
    %10 = vector.shape_cast %9 : vector<1x32x8xbf16> to vector<32x8xbf16>
    %cst_12 = arith.constant dense<0.000000e+00> : vector<64x8xf32>
    %11 = tpu.matmul %8, %10, %cst_12 {dimension_numbers = #tpu.dot_dimension_numbers<[1], [0], [0], [1], [0, 0, 1, 1], [], []>} : vector<64x32xbf16>, vector<32x8xbf16>, vector<64x8xf32> -> vector<64x8xf32>
    %12 = arith.addf %5, %11 : vector<64x8xf32>
    %c0_13 = arith.constant 0 : index
    %c1_14 = arith.constant 1 : index
    %c0_15 = arith.constant 0 : index
    %c0_16 = arith.constant 0 : index
    %13 = vector.load %arg1[%c0_13, %c1_14, %c0_15, %c0_16] : memref<1x9x9x32xbf16, #tpu.memory_space<vmem>>, vector<1x8x8x32xbf16>
    %14 = vector.shape_cast %13 : vector<1x8x8x32xbf16> to vector<8x8x32xbf16>
    %15 = vector.shape_cast %14 : vector<8x8x32xbf16> to vector<64x32xbf16>
    %c2 = arith.constant 2 : index
    %c0_17 = arith.constant 0 : index
    %c0_18 = arith.constant 0 : index
    %16 = vector.load %arg2[%c2, %c0_17, %c0_18] : memref<4x32x8xbf16, #tpu.memory_space<vmem>>, vector<1x32x8xbf16>
    %17 = vector.shape_cast %16 : vector<1x32x8xbf16> to vector<32x8xbf16>
    %cst_19 = arith.constant dense<0.000000e+00> : vector<64x8xf32>
    %18 = tpu.matmul %15, %17, %cst_19 {dimension_numbers = #tpu.dot_dimension_numbers<[1], [0], [0], [1], [0, 0, 1, 1], [], []>} : vector<64x32xbf16>, vector<32x8xbf16>, vector<64x8xf32> -> vector<64x8xf32>
    %19 = arith.addf %12, %18 : vector<64x8xf32>
    %c0_20 = arith.constant 0 : index
    %c1_21 = arith.constant 1 : index
    %c1_22 = arith.constant 1 : index
    %c0_23 = arith.constant 0 : index
    %20 = vector.load %arg1[%c0_20, %c1_21, %c1_22, %c0_23] : memref<1x9x9x32xbf16, #tpu.memory_space<vmem>>, vector<1x8x8x32xbf16>
    %21 = vector.shape_cast %20 : vector<1x8x8x32xbf16> to vector<8x8x32xbf16>
    %22 = vector.shape_cast %21 : vector<8x8x32xbf16> to vector<64x32xbf16>
    %c3 = arith.constant 3 : index
    %c0_24 = arith.constant 0 : index
    %c0_25 = arith.constant 0 : index
    %23 = vector.load %arg2[%c3, %c0_24, %c0_25] : memref<4x32x8xbf16, #tpu.memory_space<vmem>>, vector<1x32x8xbf16>
    %24 = vector.shape_cast %23 : vector<1x32x8xbf16> to vector<32x8xbf16>
    %cst_26 = arith.constant dense<0.000000e+00> : vector<64x8xf32>
    %25 = tpu.matmul %22, %24, %cst_26 {dimension_numbers = #tpu.dot_dimension_numbers<[1], [0], [0], [1], [0, 0, 1, 1], [], []>} : vector<64x32xbf16>, vector<32x8xbf16>, vector<64x8xf32> -> vector<64x8xf32>
    %26 = arith.addf %19, %25 : vector<64x8xf32>
    %c0_27 = arith.constant 0 : index
    %c0_28 = arith.constant 0 : index
    %27 = vector.load %arg3[%c0_27, %c0_28] : memref<1x8xf32, #tpu.memory_space<vmem>>, vector<1x8xf32>
    %28 = vector.broadcast %27 : vector<1x8xf32> to vector<64x8xf32>
    %29 = arith.addf %26, %28 : vector<64x8xf32>
    %cst_29 = arith.constant 0.000000e+00 : f32
    %30 = vector.broadcast %cst_29 : f32 to vector<64x8xf32>
    %31 = arith.cmpf oge, %29, %30 : vector<64x8xf32>
    %cst_30 = arith.constant 1.000000e-01 : f32
    %32 = vector.broadcast %cst_30 : f32 to vector<64x8xf32>
    %33 = arith.mulf %32, %29 : vector<64x8xf32>
    %34 = arith.select %31, %29, %33 : vector<64x8xi1>, vector<64x8xf32>
    %cst_31 = arith.constant 0.000000e+00 : bf16
    %35 = vector.broadcast %cst_31 : bf16 to vector<10x10x8xbf16>
    %c0_32 = arith.constant 0 : index
    %c0_33 = arith.constant 0 : index
    %c0_34 = arith.constant 0 : index
    %36 = vector.load %arg9[%c0_32, %c0_33, %c0_34] : memref<10x10x8xbf16, #tpu.memory_space<vmem>>, vector<10x10x8xbf16>
    tpu.vector_store %arg9[%c0_32, %c0_33, %c0_34], %35 {strides = array<i32>} : memref<10x10x8xbf16, #tpu.memory_space<vmem>>, vector<10x10x8xbf16>,
    %37 = vector.shape_cast %34 : vector<64x8xf32> to vector<8x8x8xf32>
    %38 = arith.truncf %37 : vector<8x8x8xf32> to vector<8x8x8xbf16>
    %c1_35 = arith.constant 1 : index
    %c1_36 = arith.constant 1 : index
    %c0_37 = arith.constant 0 : index
    %39 = vector.load %arg9[%c1_35, %c1_36, %c0_37] : memref<10x10x8xbf16, #tpu.memory_space<vmem>>, vector<8x8x8xbf16>
    tpu.vector_store %arg9[%c1_35, %c1_36, %c0_37], %38 {strides = array<i32>} : memref<10x10x8xbf16, #tpu.memory_space<vmem>>, vector<8x8x8xbf16>,
    %c0_38 = arith.constant 0 : index
    %c0_39 = arith.constant 0 : index
    %c0_40 = arith.constant 0 : index
    %40 = vector.load %arg9[%c0_38, %c0_39, %c0_40] : memref<10x10x8xbf16, #tpu.memory_space<vmem>>, vector<8x8x8xbf16>
    %41 = vector.shape_cast %40 : vector<8x8x8xbf16> to vector<64x8xbf16>
    %c0_41 = arith.constant 0 : index
    %c0_42 = arith.constant 0 : index
    %c0_43 = arith.constant 0 : index
    %42 = vector.load %arg4[%c0_41, %c0_42, %c0_43] : memref<9x8x16xbf16, #tpu.memory_space<vmem>>, vector<1x8x16xbf16>
    %43 = vector.shape_cast %42 : vector<1x8x16xbf16> to vector<8x16xbf16>
    %cst_44 = arith.constant dense<0.000000e+00> : vector<64x16xf32>
    %44 = tpu.matmul %41, %43, %cst_44 {dimension_numbers = #tpu.dot_dimension_numbers<[1], [0], [0], [1], [0, 0, 1, 1], [], []>} : vector<64x8xbf16>, vector<8x16xbf16>, vector<64x16xf32> -> vector<64x16xf32>
    %c0_45 = arith.constant 0 : index
    %c1_46 = arith.constant 1 : index
    %c0_47 = arith.constant 0 : index
    %45 = vector.load %arg9[%c0_45, %c1_46, %c0_47] : memref<10x10x8xbf16, #tpu.memory_space<vmem>>, vector<8x8x8xbf16>
    %46 = vector.shape_cast %45 : vector<8x8x8xbf16> to vector<64x8xbf16>
    %c1_48 = arith.constant 1 : index
    %c0_49 = arith.constant 0 : index
    %c0_50 = arith.constant 0 : index
    %47 = vector.load %arg4[%c1_48, %c0_49, %c0_50] : memref<9x8x16xbf16, #tpu.memory_space<vmem>>, vector<1x8x16xbf16>
    %48 = vector.shape_cast %47 : vector<1x8x16xbf16> to vector<8x16xbf16>
    %cst_51 = arith.constant dense<0.000000e+00> : vector<64x16xf32>
    %49 = tpu.matmul %46, %48, %cst_51 {dimension_numbers = #tpu.dot_dimension_numbers<[1], [0], [0], [1], [0, 0, 1, 1], [], []>} : vector<64x8xbf16>, vector<8x16xbf16>, vector<64x16xf32> -> vector<64x16xf32>
    %50 = arith.addf %44, %49 : vector<64x16xf32>
    %c0_52 = arith.constant 0 : index
    %c2_53 = arith.constant 2 : index
    %c0_54 = arith.constant 0 : index
    %51 = vector.load %arg9[%c0_52, %c2_53, %c0_54] : memref<10x10x8xbf16, #tpu.memory_space<vmem>>, vector<8x8x8xbf16>
    %52 = vector.shape_cast %51 : vector<8x8x8xbf16> to vector<64x8xbf16>
    %c2_55 = arith.constant 2 : index
    %c0_56 = arith.constant 0 : index
    %c0_57 = arith.constant 0 : index
    %53 = vector.load %arg4[%c2_55, %c0_56, %c0_57] : memref<9x8x16xbf16, #tpu.memory_space<vmem>>, vector<1x8x16xbf16>
    %54 = vector.shape_cast %53 : vector<1x8x16xbf16> to vector<8x16xbf16>
    %cst_58 = arith.constant dense<0.000000e+00> : vector<64x16xf32>
    %55 = tpu.matmul %52, %54, %cst_58 {dimension_numbers = #tpu.dot_dimension_numbers<[1], [0], [0], [1], [0, 0, 1, 1], [], []>} : vector<64x8xbf16>, vector<8x16xbf16>, vector<64x16xf32> -> vector<64x16xf32>
    %56 = arith.addf %50, %55 : vector<64x16xf32>
    %c1_59 = arith.constant 1 : index
    %c0_60 = arith.constant 0 : index
    %c0_61 = arith.constant 0 : index
    %57 = vector.load %arg9[%c1_59, %c0_60, %c0_61] : memref<10x10x8xbf16, #tpu.memory_space<vmem>>, vector<8x8x8xbf16>
    %58 = vector.shape_cast %57 : vector<8x8x8xbf16> to vector<64x8xbf16>
    %c3_62 = arith.constant 3 : index
    %c0_63 = arith.constant 0 : index
    %c0_64 = arith.constant 0 : index
    %59 = vector.load %arg4[%c3_62, %c0_63, %c0_64] : memref<9x8x16xbf16, #tpu.memory_space<vmem>>, vector<1x8x16xbf16>
    %60 = vector.shape_cast %59 : vector<1x8x16xbf16> to vector<8x16xbf16>
    %cst_65 = arith.constant dense<0.000000e+00> : vector<64x16xf32>
    %61 = tpu.matmul %58, %60, %cst_65 {dimension_numbers = #tpu.dot_dimension_numbers<[1], [0], [0], [1], [0, 0, 1, 1], [], []>} : vector<64x8xbf16>, vector<8x16xbf16>, vector<64x16xf32> -> vector<64x16xf32>
    %62 = arith.addf %56, %61 : vector<64x16xf32>
    %c1_66 = arith.constant 1 : index
    %c1_67 = arith.constant 1 : index
    %c0_68 = arith.constant 0 : index
    %63 = vector.load %arg9[%c1_66, %c1_67, %c0_68] : memref<10x10x8xbf16, #tpu.memory_space<vmem>>, vector<8x8x8xbf16>
    %64 = vector.shape_cast %63 : vector<8x8x8xbf16> to vector<64x8xbf16>
    %c4 = arith.constant 4 : index
    %c0_69 = arith.constant 0 : index
    %c0_70 = arith.constant 0 : index
    %65 = vector.load %arg4[%c4, %c0_69, %c0_70] : memref<9x8x16xbf16, #tpu.memory_space<vmem>>, vector<1x8x16xbf16>
    %66 = vector.shape_cast %65 : vector<1x8x16xbf16> to vector<8x16xbf16>
    %cst_71 = arith.constant dense<0.000000e+00> : vector<64x16xf32>
    %67 = tpu.matmul %64, %66, %cst_71 {dimension_numbers = #tpu.dot_dimension_numbers<[1], [0], [0], [1], [0, 0, 1, 1], [], []>} : vector<64x8xbf16>, vector<8x16xbf16>, vector<64x16xf32> -> vector<64x16xf32>
    %68 = arith.addf %62, %67 : vector<64x16xf32>
    %c1_72 = arith.constant 1 : index
    %c2_73 = arith.constant 2 : index
    %c0_74 = arith.constant 0 : index
    %69 = vector.load %arg9[%c1_72, %c2_73, %c0_74] : memref<10x10x8xbf16, #tpu.memory_space<vmem>>, vector<8x8x8xbf16>
    %70 = vector.shape_cast %69 : vector<8x8x8xbf16> to vector<64x8xbf16>
    %c5 = arith.constant 5 : index
    %c0_75 = arith.constant 0 : index
    %c0_76 = arith.constant 0 : index
    %71 = vector.load %arg4[%c5, %c0_75, %c0_76] : memref<9x8x16xbf16, #tpu.memory_space<vmem>>, vector<1x8x16xbf16>
    %72 = vector.shape_cast %71 : vector<1x8x16xbf16> to vector<8x16xbf16>
    %cst_77 = arith.constant dense<0.000000e+00> : vector<64x16xf32>
    %73 = tpu.matmul %70, %72, %cst_77 {dimension_numbers = #tpu.dot_dimension_numbers<[1], [0], [0], [1], [0, 0, 1, 1], [], []>} : vector<64x8xbf16>, vector<8x16xbf16>, vector<64x16xf32> -> vector<64x16xf32>
    %74 = arith.addf %68, %73 : vector<64x16xf32>
    %c2_78 = arith.constant 2 : index
    %c0_79 = arith.constant 0 : index
    %c0_80 = arith.constant 0 : index
    %75 = vector.load %arg9[%c2_78, %c0_79, %c0_80] : memref<10x10x8xbf16, #tpu.memory_space<vmem>>, vector<8x8x8xbf16>
    %76 = vector.shape_cast %75 : vector<8x8x8xbf16> to vector<64x8xbf16>
    %c6 = arith.constant 6 : index
    %c0_81 = arith.constant 0 : index
    %c0_82 = arith.constant 0 : index
    %77 = vector.load %arg4[%c6, %c0_81, %c0_82] : memref<9x8x16xbf16, #tpu.memory_space<vmem>>, vector<1x8x16xbf16>
    %78 = vector.shape_cast %77 : vector<1x8x16xbf16> to vector<8x16xbf16>
    %cst_83 = arith.constant dense<0.000000e+00> : vector<64x16xf32>
    %79 = tpu.matmul %76, %78, %cst_83 {dimension_numbers = #tpu.dot_dimension_numbers<[1], [0], [0], [1], [0, 0, 1, 1], [], []>} : vector<64x8xbf16>, vector<8x16xbf16>, vector<64x16xf32> -> vector<64x16xf32>
    %80 = arith.addf %74, %79 : vector<64x16xf32>
    %c2_84 = arith.constant 2 : index
    %c1_85 = arith.constant 1 : index
    %c0_86 = arith.constant 0 : index
    %81 = vector.load %arg9[%c2_84, %c1_85, %c0_86] : memref<10x10x8xbf16, #tpu.memory_space<vmem>>, vector<8x8x8xbf16>
    %82 = vector.shape_cast %81 : vector<8x8x8xbf16> to vector<64x8xbf16>
    %c7 = arith.constant 7 : index
    %c0_87 = arith.constant 0 : index
    %c0_88 = arith.constant 0 : index
    %83 = vector.load %arg4[%c7, %c0_87, %c0_88] : memref<9x8x16xbf16, #tpu.memory_space<vmem>>, vector<1x8x16xbf16>
    %84 = vector.shape_cast %83 : vector<1x8x16xbf16> to vector<8x16xbf16>
    %cst_89 = arith.constant dense<0.000000e+00> : vector<64x16xf32>
    %85 = tpu.matmul %82, %84, %cst_89 {dimension_numbers = #tpu.dot_dimension_numbers<[1], [0], [0], [1], [0, 0, 1, 1], [], []>} : vector<64x8xbf16>, vector<8x16xbf16>, vector<64x16xf32> -> vector<64x16xf32>
    %86 = arith.addf %80, %85 : vector<64x16xf32>
    %c2_90 = arith.constant 2 : index
    %c2_91 = arith.constant 2 : index
    %c0_92 = arith.constant 0 : index
    %87 = vector.load %arg9[%c2_90, %c2_91, %c0_92] : memref<10x10x8xbf16, #tpu.memory_space<vmem>>, vector<8x8x8xbf16>
    %88 = vector.shape_cast %87 : vector<8x8x8xbf16> to vector<64x8xbf16>
    %c8 = arith.constant 8 : index
    %c0_93 = arith.constant 0 : index
    %c0_94 = arith.constant 0 : index
    %89 = vector.load %arg4[%c8, %c0_93, %c0_94] : memref<9x8x16xbf16, #tpu.memory_space<vmem>>, vector<1x8x16xbf16>
    %90 = vector.shape_cast %89 : vector<1x8x16xbf16> to vector<8x16xbf16>
    %cst_95 = arith.constant dense<0.000000e+00> : vector<64x16xf32>
    %91 = tpu.matmul %88, %90, %cst_95 {dimension_numbers = #tpu.dot_dimension_numbers<[1], [0], [0], [1], [0, 0, 1, 1], [], []>} : vector<64x8xbf16>, vector<8x16xbf16>, vector<64x16xf32> -> vector<64x16xf32>
    %92 = arith.addf %86, %91 : vector<64x16xf32>
    %c0_96 = arith.constant 0 : index
    %c0_97 = arith.constant 0 : index
    %93 = vector.load %arg5[%c0_96, %c0_97] : memref<1x16xf32, #tpu.memory_space<vmem>>, vector<1x16xf32>
    %94 = vector.broadcast %93 : vector<1x16xf32> to vector<64x16xf32>
    %95 = arith.addf %92, %94 : vector<64x16xf32>
    %cst_98 = arith.constant 0.000000e+00 : f32
    %96 = vector.broadcast %cst_98 : f32 to vector<64x16xf32>
    %97 = arith.cmpf oge, %95, %96 : vector<64x16xf32>
    %cst_99 = arith.constant 1.000000e-01 : f32
    %98 = vector.broadcast %cst_99 : f32 to vector<64x16xf32>
    %99 = arith.mulf %98, %95 : vector<64x16xf32>
    %100 = arith.select %97, %95, %99 : vector<64x16xi1>, vector<64x16xf32>
    %cst_100 = arith.constant 0.000000e+00 : f32
    %101 = vector.broadcast %cst_100 : f32 to vector<10x10x16xf32>
    %c0_101 = arith.constant 0 : index
    %c0_102 = arith.constant 0 : index
    %c0_103 = arith.constant 0 : index
    %102 = vector.load %arg10[%c0_101, %c0_102, %c0_103] : memref<10x10x16xf32, #tpu.memory_space<vmem>>, vector<10x10x16xf32>
    tpu.vector_store %arg10[%c0_101, %c0_102, %c0_103], %101 {strides = array<i32>} : memref<10x10x16xf32, #tpu.memory_space<vmem>>, vector<10x10x16xf32>,
    %103 = vector.shape_cast %100 : vector<64x16xf32> to vector<8x8x16xf32>
    %c1_104 = arith.constant 1 : index
    %c1_105 = arith.constant 1 : index
    %c0_106 = arith.constant 0 : index
    %104 = vector.load %arg10[%c1_104, %c1_105, %c0_106] : memref<10x10x16xf32, #tpu.memory_space<vmem>>, vector<8x8x16xf32>
    tpu.vector_store %arg10[%c1_104, %c1_105, %c0_106], %103 {strides = array<i32>} : memref<10x10x16xf32, #tpu.memory_space<vmem>>, vector<8x8x16xf32>,
    %c0_107 = arith.constant 0 : index
    %c0_108 = arith.constant 0 : index
    %c0_109 = arith.constant 0 : index
    %105 = vector.load %arg10[%c0_107, %c0_108, %c0_109] : memref<10x10x16xf32, #tpu.memory_space<vmem>>, vector<8x8x16xf32>
    %c0_110 = arith.constant 0 : index
    %c0_111 = arith.constant 0 : index
    %c0_112 = arith.constant 0 : index
    %106 = vector.load %arg6[%c0_110, %c0_111, %c0_112] : memref<9x1x16xf32, #tpu.memory_space<vmem>>, vector<1x1x16xf32>
    %107 = vector.shape_cast %106 : vector<1x1x16xf32> to vector<1x16xf32>
    %108 = vector.shape_cast %107 : vector<1x16xf32> to vector<1x1x16xf32>
    %109 = vector.broadcast %108 : vector<1x1x16xf32> to vector<8x8x16xf32>
    %110 = arith.mulf %105, %109 : vector<8x8x16xf32>
    %c0_113 = arith.constant 0 : index
    %c1_114 = arith.constant 1 : index
    %c0_115 = arith.constant 0 : index
    %111 = vector.load %arg10[%c0_113, %c1_114, %c0_115] : memref<10x10x16xf32, #tpu.memory_space<vmem>>, vector<8x8x16xf32>
    %c1_116 = arith.constant 1 : index
    %c0_117 = arith.constant 0 : index
    %c0_118 = arith.constant 0 : index
    %112 = vector.load %arg6[%c1_116, %c0_117, %c0_118] : memref<9x1x16xf32, #tpu.memory_space<vmem>>, vector<1x1x16xf32>
    %113 = vector.shape_cast %112 : vector<1x1x16xf32> to vector<1x16xf32>
    %114 = vector.shape_cast %113 : vector<1x16xf32> to vector<1x1x16xf32>
    %115 = vector.broadcast %114 : vector<1x1x16xf32> to vector<8x8x16xf32>
    %116 = arith.mulf %111, %115 : vector<8x8x16xf32>
    %117 = arith.addf %110, %116 : vector<8x8x16xf32>
    %c0_119 = arith.constant 0 : index
    %c2_120 = arith.constant 2 : index
    %c0_121 = arith.constant 0 : index
    %118 = vector.load %arg10[%c0_119, %c2_120, %c0_121] : memref<10x10x16xf32, #tpu.memory_space<vmem>>, vector<8x8x16xf32>
    %c2_122 = arith.constant 2 : index
    %c0_123 = arith.constant 0 : index
    %c0_124 = arith.constant 0 : index
    %119 = vector.load %arg6[%c2_122, %c0_123, %c0_124] : memref<9x1x16xf32, #tpu.memory_space<vmem>>, vector<1x1x16xf32>
    %120 = vector.shape_cast %119 : vector<1x1x16xf32> to vector<1x16xf32>
    %121 = vector.shape_cast %120 : vector<1x16xf32> to vector<1x1x16xf32>
    %122 = vector.broadcast %121 : vector<1x1x16xf32> to vector<8x8x16xf32>
    %123 = arith.mulf %118, %122 : vector<8x8x16xf32>
    %124 = arith.addf %117, %123 : vector<8x8x16xf32>
    %c1_125 = arith.constant 1 : index
    %c0_126 = arith.constant 0 : index
    %c0_127 = arith.constant 0 : index
    %125 = vector.load %arg10[%c1_125, %c0_126, %c0_127] : memref<10x10x16xf32, #tpu.memory_space<vmem>>, vector<8x8x16xf32>
    %c3_128 = arith.constant 3 : index
    %c0_129 = arith.constant 0 : index
    %c0_130 = arith.constant 0 : index
    %126 = vector.load %arg6[%c3_128, %c0_129, %c0_130] : memref<9x1x16xf32, #tpu.memory_space<vmem>>, vector<1x1x16xf32>
    %127 = vector.shape_cast %126 : vector<1x1x16xf32> to vector<1x16xf32>
    %128 = vector.shape_cast %127 : vector<1x16xf32> to vector<1x1x16xf32>
    %129 = vector.broadcast %128 : vector<1x1x16xf32> to vector<8x8x16xf32>
    %130 = arith.mulf %125, %129 : vector<8x8x16xf32>
    %131 = arith.addf %124, %130 : vector<8x8x16xf32>
    %c1_131 = arith.constant 1 : index
    %c1_132 = arith.constant 1 : index
    %c0_133 = arith.constant 0 : index
    %132 = vector.load %arg10[%c1_131, %c1_132, %c0_133] : memref<10x10x16xf32, #tpu.memory_space<vmem>>, vector<8x8x16xf32>
    %c4_134 = arith.constant 4 : index
    %c0_135 = arith.constant 0 : index
    %c0_136 = arith.constant 0 : index
    %133 = vector.load %arg6[%c4_134, %c0_135, %c0_136] : memref<9x1x16xf32, #tpu.memory_space<vmem>>, vector<1x1x16xf32>
    %134 = vector.shape_cast %133 : vector<1x1x16xf32> to vector<1x16xf32>
    %135 = vector.shape_cast %134 : vector<1x16xf32> to vector<1x1x16xf32>
    %136 = vector.broadcast %135 : vector<1x1x16xf32> to vector<8x8x16xf32>
    %137 = arith.mulf %132, %136 : vector<8x8x16xf32>
    %138 = arith.addf %131, %137 : vector<8x8x16xf32>
    %c1_137 = arith.constant 1 : index
    %c2_138 = arith.constant 2 : index
    %c0_139 = arith.constant 0 : index
    %139 = vector.load %arg10[%c1_137, %c2_138, %c0_139] : memref<10x10x16xf32, #tpu.memory_space<vmem>>, vector<8x8x16xf32>
    %c5_140 = arith.constant 5 : index
    %c0_141 = arith.constant 0 : index
    %c0_142 = arith.constant 0 : index
    %140 = vector.load %arg6[%c5_140, %c0_141, %c0_142] : memref<9x1x16xf32, #tpu.memory_space<vmem>>, vector<1x1x16xf32>
    %141 = vector.shape_cast %140 : vector<1x1x16xf32> to vector<1x16xf32>
    %142 = vector.shape_cast %141 : vector<1x16xf32> to vector<1x1x16xf32>
    %143 = vector.broadcast %142 : vector<1x1x16xf32> to vector<8x8x16xf32>
    %144 = arith.mulf %139, %143 : vector<8x8x16xf32>
    %145 = arith.addf %138, %144 : vector<8x8x16xf32>
    %c2_143 = arith.constant 2 : index
    %c0_144 = arith.constant 0 : index
    %c0_145 = arith.constant 0 : index
    %146 = vector.load %arg10[%c2_143, %c0_144, %c0_145] : memref<10x10x16xf32, #tpu.memory_space<vmem>>, vector<8x8x16xf32>
    %c6_146 = arith.constant 6 : index
    %c0_147 = arith.constant 0 : index
    %c0_148 = arith.constant 0 : index
    %147 = vector.load %arg6[%c6_146, %c0_147, %c0_148] : memref<9x1x16xf32, #tpu.memory_space<vmem>>, vector<1x1x16xf32>
    %148 = vector.shape_cast %147 : vector<1x1x16xf32> to vector<1x16xf32>
    %149 = vector.shape_cast %148 : vector<1x16xf32> to vector<1x1x16xf32>
    %150 = vector.broadcast %149 : vector<1x1x16xf32> to vector<8x8x16xf32>
    %151 = arith.mulf %146, %150 : vector<8x8x16xf32>
    %152 = arith.addf %145, %151 : vector<8x8x16xf32>
    %c2_149 = arith.constant 2 : index
    %c1_150 = arith.constant 1 : index
    %c0_151 = arith.constant 0 : index
    %153 = vector.load %arg10[%c2_149, %c1_150, %c0_151] : memref<10x10x16xf32, #tpu.memory_space<vmem>>, vector<8x8x16xf32>
    %c7_152 = arith.constant 7 : index
    %c0_153 = arith.constant 0 : index
    %c0_154 = arith.constant 0 : index
    %154 = vector.load %arg6[%c7_152, %c0_153, %c0_154] : memref<9x1x16xf32, #tpu.memory_space<vmem>>, vector<1x1x16xf32>
    %155 = vector.shape_cast %154 : vector<1x1x16xf32> to vector<1x16xf32>
    %156 = vector.shape_cast %155 : vector<1x16xf32> to vector<1x1x16xf32>
    %157 = vector.broadcast %156 : vector<1x1x16xf32> to vector<8x8x16xf32>
    %158 = arith.mulf %153, %157 : vector<8x8x16xf32>
    %159 = arith.addf %152, %158 : vector<8x8x16xf32>
    %c2_155 = arith.constant 2 : index
    %c2_156 = arith.constant 2 : index
    %c0_157 = arith.constant 0 : index
    %160 = vector.load %arg10[%c2_155, %c2_156, %c0_157] : memref<10x10x16xf32, #tpu.memory_space<vmem>>, vector<8x8x16xf32>
    %c8_158 = arith.constant 8 : index
    %c0_159 = arith.constant 0 : index
    %c0_160 = arith.constant 0 : index
    %161 = vector.load %arg6[%c8_158, %c0_159, %c0_160] : memref<9x1x16xf32, #tpu.memory_space<vmem>>, vector<1x1x16xf32>
    %162 = vector.shape_cast %161 : vector<1x1x16xf32> to vector<1x16xf32>
    %163 = vector.shape_cast %162 : vector<1x16xf32> to vector<1x1x16xf32>
    %164 = vector.broadcast %163 : vector<1x1x16xf32> to vector<8x8x16xf32>
    %165 = arith.mulf %160, %164 : vector<8x8x16xf32>
    %166 = arith.addf %159, %165 : vector<8x8x16xf32>
    %cst_161 = arith.constant dense<0.000000e+00> : vector<8x8xf32>
    %167 = vector.multi_reduction <add>, %166, %cst_161 [2] : vector<8x8x16xf32> to vector<8x8xf32>
    %c0_162 = arith.constant 0 : index
    %c0_163 = arith.constant 0 : index
    %168 = vector.load %arg7[%c0_162, %c0_163] : memref<1x1xf32, #tpu.memory_space<vmem>>, vector<1x1xf32>
    %169 = vector.broadcast %168 : vector<1x1xf32> to vector<8x8xf32>
    %170 = arith.addf %167, %169 : vector<8x8xf32>
    %c0_164 = arith.constant 0 : index
    %c0_165 = arith.constant 0 : index
    %c0_166 = arith.constant 0 : index
    %171 = vector.load %arg8[%c0_164, %c0_165, %c0_166] : memref<1x8x8xf32, #tpu.memory_space<vmem>>, vector<1x8x8xf32>
    %172 = vector.shape_cast %171 : vector<1x8x8xf32> to vector<8x8xf32>
    %173 = vector.shape_cast %170 : vector<8x8xf32> to vector<1x8x8xf32>
    tpu.vector_store %arg8[%c0_164, %c0_165, %c0_166], %173 {strides = array<i32>} : memref<1x8x8xf32, #tpu.memory_space<vmem>>, vector<1x8x8xf32>,
    return
  }
  func.func @transform_0(%arg0: i32) -> (i32, i32, i32, i32) {
    %c0_i32 = arith.constant 0 : i32
    %c0_i32_0 = arith.constant 0 : i32
    %c0_i32_1 = arith.constant 0 : i32
    %c0_i32_2 = arith.constant 0 : i32
    return %arg0, %c0_i32, %c0_i32_0, %c0_i32_1 : i32, i32, i32, i32
  }
  func.func @transform_1(%arg0: i32) -> (i32, i32, i32) {
    %c0_i32 = arith.constant 0 : i32
    %c0_i32_0 = arith.constant 0 : i32
    %c0_i32_1 = arith.constant 0 : i32
    %c0_i32_2 = arith.constant 0 : i32
    return %c0_i32, %c0_i32_0, %c0_i32_1 : i32, i32, i32
  }
  func.func @transform_2(%arg0: i32) -> (i32, i32) {
    %c0_i32 = arith.constant 0 : i32
    %c0_i32_0 = arith.constant 0 : i32
    %c0_i32_1 = arith.constant 0 : i32
    return %c0_i32, %c0_i32_0 : i32, i32
  }
  func.func @transform_3(%arg0: i32) -> (i32, i32, i32) {
    %c0_i32 = arith.constant 0 : i32
    %c0_i32_0 = arith.constant 0 : i32
    %c0_i32_1 = arith.constant 0 : i32
    %c0_i32_2 = arith.constant 0 : i32
    return %c0_i32, %c0_i32_0, %c0_i32_1 : i32, i32, i32
  }
  func.func @transform_4(%arg0: i32) -> (i32, i32) {
    %c0_i32 = arith.constant 0 : i32
    %c0_i32_0 = arith.constant 0 : i32
    %c0_i32_1 = arith.constant 0 : i32
    return %c0_i32, %c0_i32_0 : i32, i32
  }
  func.func @transform_5(%arg0: i32) -> (i32, i32, i32) {
    %c0_i32 = arith.constant 0 : i32
    %c0_i32_0 = arith.constant 0 : i32
    %c0_i32_1 = arith.constant 0 : i32
    %c0_i32_2 = arith.constant 0 : i32
    return %c0_i32, %c0_i32_0, %c0_i32_1 : i32, i32, i32
  }
  func.func @transform_6(%arg0: i32) -> (i32, i32) {
    %c0_i32 = arith.constant 0 : i32
    %c0_i32_0 = arith.constant 0 : i32
    %c0_i32_1 = arith.constant 0 : i32
    return %c0_i32, %c0_i32_0 : i32, i32
  }
  func.func @transform_7(%arg0: i32) -> (i32, i32, i32) {
    %c0_i32 = arith.constant 0 : i32
    %c0_i32_0 = arith.constant 0 : i32
    %c0_i32_1 = arith.constant 0 : i32
    return %arg0, %c0_i32, %c0_i32_0 : i32, i32, i32
  }
}

</mosaic_0001>

<bundles_post_ra>
// kernel: dispnet_forward_fused.1
= control target key start
LH: loop header
LB: loop body
LE: loop exit
PB: predicated region body
PF: predicated region fallthrough
CT: control target
= control target key end

     0   :  { %s4866_s0 = inlined_call_operand.vmem [shape: bf16[2,9,9,32], index: 0, kind: input, shape index: {}]   ;;  %s4867_s1 = inlined_call_operand.vmem [shape: bf16[4,32,8], index: 1, kind: input, shape index: {}]   ;;  %s4868_s2 = inlined_call_operand.vmem [shape: f32[1,8], index: 2, kind: input, shape index: {}]   ;;  %s4869_s3 = inlined_call_operand.vmem [shape: bf16[9,8,16], index: 3, kind: input, shape index: {}]   ;;  %s4870_s4 = inlined_call_operand.vmem [shape: f32[1,16], index: 4, kind: input, shape index: {}]   ;;  %s4871_s5 = inlined_call_operand.vmem [shape: f32[9,1,16], index: 5, kind: input, shape index: {}]   ;;  %s4872_s6 = inlined_call_operand.<no memory space> [shape: f32[1,1], index: 6, kind: input, shape index: {}]   ;;  %s4873_s7 = inlined_call_operand.hbm [shape: f32[2,8,8], index: 7, kind: output, shape index: {}]  }
   0x1   :  { %v12_v0 = vstv %s4872_s6 }
   0x2   :  { %13 = vst [vmem:[#allocation4] sm:$0x1] %v12_v0 }
   0x3   :  { %14 = vsyncpa [#allocation6], 0 }
   0x4   :  { %16 = vsyncpa [#allocation6 + $0x1], 0  ;;  %s3880_s26 = smov 0   ;;  %s3882_s27 = smov 0  }
   0x5   :  { %s3884_s28 = smov 0   ;;  %s3886_s29 = smov 0  }
   0x6 LB: > { %s3901_s6 = sadd.s32 4294967295, %s3832_s29   ;;  %s3254_s30 = sadd.s32 4294967294, %s3832_s29   ;;  %s3832_s29 = sphi %s3886_s29, %s4893_s29   ;;  %s3828_s28 = sphi %s3884_s28, %s4892_s28   ;;  %s3824_s27 = sphi %s3882_s27, %s4891_s27   ;;  %s3820_s26 = sphi %s3880_s26, %s4890_s26  }
   0x7   : > { %s3905_s8 = sadd.s32 1, %s3832_s29   ;;  %s181_s9 = sadd.s32 1, %s3828_s28 }
   0x8   : > { %s178_s10 = ssub.s32 %s3832_s29, %s3905_s8  ;;  %p191_p0 = scmp.ne.s32.totalorder %s3828_s28, %s3824_s27 }
   0x9   : > { %p179_p1 = scmp.eq.s32.totalorder %s178_s10, 0  ;;  %p192_p2 = scmp.eq.s32.totalorder %s3901_s6, 1 }
   0xa   : > { %p197_p3 = scmp.ne.s32.totalorder %s3824_s27, %s3820_s26  ;;  %p198_p4 = scmp.eq.s32.totalorder %s3254_s30, 1 }
   0xb   : > { %s3916_s11 = scalar_select %p179_p1, %s3828_s28, %s181_s9  }
   0xc   : > { %p3918_p5 = por %p192_p2, %p191_p0  ;;  %p3922_p6 = por %p198_p4, %p197_p3 }
   0xd   : > { %p3257_p7 = scmp.ge.s32.totalorder %s3832_s29, 1  ;;  %p242_p8 = scmp.lt.s32.totalorder %s3832_s29, 3 }
   0xf   : > { %p243_p9 = pnand %p3257_p7, %p242_p8 }
  0x11   : > { %246 = sbr.rel (%p243_p9) target bundleno = 809 (0x329), region = 48 }
  0x16   : > { %v3743_v1 = vld [vmem:[%s4867_s1 + $0x18] sm:$0xff]   ;;  %p274_p10 = scmp.lt.s32.totalorder %s3901_s6, 1  ;;  %v3744_v2 = vld [vmem:[%s4867_s1 + $0x10] sm:$0xff]   ;;  %v3939_v3 = vld [vmem:[%s4867_s1 + $0x8] sm:$0xff]   ;;  %vm300_vm0 = vsmask.f32 3328 }
  0x17   : > { %3687 = vmatprep.subr.bf16.mxu1 %v3743_v1  ;;  %3549 = vmatprep.subr.bf16.mxu0 %v3743_v1  ;;  %v3944_v4 = vld [vmem:[%s4867_s1 + $0x28] sm:$0xff]   ;;  %vm301_vm1 = vsmask.f32 7440  ;;  %vm444_vm2 = vcmask 261120   ;;  %vm1043_vm4 = vcmask 60416   ;;  %vm1045_vm5 = vcmask 57344  }
  0x18   : > { %s275_s18 = scalar_select %p274_p10, %s3901_s6, 1  ;;  %3689 = vmatpush3.bf16.msra.mxu1 %v3743_v1  ;;  %3550 = vmatpush3.bf16.msra.mxu0 %v3743_v1  ;;  %vm3982_vm3 = vmor %vm300_vm0, %vm301_vm1  ;;  %vm1388_vm6 = vcmask 1043456   ;;  %vm1179_vm7 = vsmask.f32 7938  ;;  %vm1185_vm8 = vsmask.f32 256 }
  0x19   : > { %3688 = vmatprep.subr.bf16.mxu1 %v3744_v2  ;;  %3551 = vmatprep.subr.bf16.mxu0 %v3744_v2  ;;  %vm4219_vm12 = vmand %vm1043_vm4, %vm1179_vm7  ;;  %vm1375_vm0 = vcmask 64512   ;;  %vm1582_vm7 = vcmask 1046532   ;;  %s271_s15 = sand.u32 1, %s3824_s27   ;;  %s3469_s17 = sshll.u32 %s3901_s6, 7 }
  0x1a   : > { %s3700_s21 = smul.u32 72, %s275_s18  ;;  %vm4225_vm13 = vmand %vm1045_vm5, %vm1185_vm8  ;;  %s4821_s16 = sshll.u32 %s271_s15, 3 }
  0x1b   : > { %s273_s18 = scalar_lea.vmem [#allocation5], %s4821_s16  ;;  %s4828_s22 = scalar_lea.hbm %s4873_s7, %s3469_s17 }
  0x1c   : > { %s3949_s30 = scalar_lea.vmem %s4866_s0, %s3700_s21  ;;  %3690 = vmatpush3.bf16.msra.mxu1 %v3744_v2  ;;  %3552 = vmatpush3.bf16.msra.mxu0 %v3744_v2  ;;  %s3195_s19 = sshll.u32 %s273_s18, 4  ;;  %s3196_s19 = int_to_ptr.vmem [resolvable:$true] %s3195_s19 }
  0x1d   : > { %v3952_v5 = vld [vmem:[%s3949_s30 + $0x20] sm:$0xf]  ;;  %v3955_v6 = vld [vmem:[%s3949_s30 + $0x28] sm:$0xf]  ;;  %v296_v7 = vld [vmem:[%s3949_s30 + $0x24] sm:$0x1]  ;;  %3561 = vmatprep.subr.bf16.mxu1 %v3939_v3  ;;  %3573 = vmatprep.subr.bf16.mxu0 %v3944_v4 }
  0x1e   : > { %v297_v8 = vld [vmem:[%s3949_s30 + $0x2c] sm:$0x1]  ;;  %v360_v9 = vshrl.u32 %v3952_v5, 16  ;;  %v363_v10 = vshll.u32 %v3952_v5, 16  ;;  %v369_v11 = vshll.u32 %v296_v7, 16  ;;  %v374_v12 = vshrl.u32 %v3955_v6, 16 }
  0x1f   : > { %v377_v13 = vshll.u32 %v3955_v6, 16  ;;  %v383_v14 = vshll.u32 %v297_v8, 16  ;;  %v3966_v15 = vld [vmem:[%s3949_s30 + $0x30] sm:$0xf]  ;;  %v3969_v16 = vld [vmem:[%s3949_s30 + $0x38] sm:$0xf] }
  0x20   : > { %v362_v17 = vrot.slane %v360_v9, 4  ;;  %v365_v18 = vrot.slane %v363_v10, 5  ;;  %v371_v19 = vrot.slane %v369_v11, 5  ;;  %v376_v20 = vrot.slane %v374_v12, 4  ;;  %v298_v21 = vld [vmem:[%s3949_s30 + $0x34] sm:$0x1] }
  0x21   : > { %v379_v22 = vrot.slane %v377_v13, 5  ;;  %v385_v23 = vrot.slane %v383_v14, 5  ;;  %v299_v24 = vld [vmem:[%s3949_s30 + $0x3c] sm:$0x1]  ;;  %v388_v25 = vshrl.u32 %v3966_v15, 16  ;;  %v391_v26 = vshll.u32 %v3966_v15, 16 }
  0x22   : > { %v366_v27 = vor.u32 %v365_v18, %v362_v17  ;;  %v397_v28 = vshll.u32 %v298_v21, 16  ;;  %v402_v29 = vshrl.u32 %v3969_v16, 16  ;;  %v405_v30 = vshll.u32 %v3969_v16, 16  ;;  %v3978_v31 = vld [vmem:[%s3949_s30] sm:$0xf]  ;;  %s3182_s6 = scalar_lea.sflag [#allocation6], %s271_s15 }
  0x23   : > { %v380_v33 = vor.u32 %v379_v22, %v376_v20  ;;  %v390_v34 = vrot.slane %v388_v25, 4  ;;  %v393_v35 = vrot.slane %v391_v26, 5  ;;  %v411_v36 = vshll.u32 %v299_v24, 16  ;;  %v281_v37 = vld [vmem:[%s3949_s30 + $0x8] sm:$0xf]  ;;  %v3747_v17 = vld [vmem:[%s4867_s1] sm:$0xff]  }
  0x24   : > { %v367_v38 = vrot.slane %v366_v27, 4  ;;  %v399_v39 = vrot.slane %v397_v28, 5  ;;  %v404_v40 = vrot.slane %v402_v29, 4  ;;  %v407_v41 = vrot.slane %v405_v30, 5  ;;  %v292_v42 = vld [vmem:[%s3949_s30 + $0x4] sm:$0x1] }
  0x25   : > { %v381_v43 = vrot.slane %v380_v33, 4  ;;  %v394_v44 = vor.u32 %v393_v35, %v390_v34  ;;  %v413_v45 = vrot.slane %v411_v36, 5  ;;  %v304_v46 = vshrl.u32 %v3978_v31, 16  ;;  %v293_v49 = vld [vmem:[%s3949_s30 + $0xc] sm:$0x1]  ;;  %v3750_v35 = vld [vmem:[%s4867_s1 + $0x38] sm:$0xff]  }
  0x26   : > { %v372_v47 = vsel %vm3982_vm3, %v367_v38, %v371_v19  ;;  %v408_v48 = vor.u32 %v407_v41, %v404_v40  ;;  %v307_v50 = vshll.u32 %v3978_v31, 16  ;;  %v313_v51 = vshll.u32 %v292_v42, 16  ;;  %v3994_v52 = vld [vmem:[%s3949_s30 + $0x10] sm:$0xf]  ;;  %v3999_v57 = vld [vmem:[%s3949_s30 + $0x18] sm:$0xf] }
  0x27   : > { %v386_v53 = vsel %vm3982_vm3, %v381_v43, %v385_v23  ;;  %v395_v54 = vrot.slane %v394_v44, 4  ;;  %v306_v55 = vrot.slane %v304_v46, 4  ;;  %v318_v56 = vshrl.u32 %v281_v37, 16  ;;  %v294_v61 = vld [vmem:[%s3949_s30 + $0x14] sm:$0x1]  ;;  %s3772_s23 = scalar_lea.vmem %s3196_s19, 128 }
  0x28   : > { %v3266_v58 = vcombine.low %v372_v47, %v386_v53  ;;  %v409_v59 = vrot.slane %v408_v48, 4  ;;  %v309_v60 = vrot.slane %v307_v50, 5  ;;  %v295_v62 = vld [vmem:[%s3949_s30 + $0x1c] sm:$0x1]  ;;  %v321_v1 = vshll.u32 %v281_v37, 16  ;;  %v3755_v41 = vld [vmem:[%s4867_s1 + $0x30] sm:$0xff]   ;;  %p3773_p11 = scmp.ne.s32.totalorder %s3196_s19, %s3772_s23 }
  0x29   : > { %v400_v63 = vsel %vm3982_vm3, %v395_v54, %v399_v39  ;;  %v320_v0 = vrot.slane %v318_v56, 4  ;;  %v327_v2 = vshll.u32 %v293_v49, 16  ;;  %v332_v9 = vshrl.u32 %v3994_v52, 16  ;;  %v3306_v42 = vld [vmem:[%s3949_s30 + $0x8] sm:$0xf]  ;;  %s3836_s24 = smov [#allocation5]  }
  0x2a   : > { %3557 = vmatprep.mubr.msk.bf16.mxu1 %vm444_vm2, %v3266_v58  ;;  %v414_v7 = vsel %vm3982_vm3, %v409_v59, %v413_v45  ;;  %v310_v8 = vor.u32 %v309_v60, %v306_v55  ;;  %v335_v10 = vshll.u32 %v3994_v52, 16  ;;  %v315_v12 = vrot.slane %v313_v51, 5  ;;  %v3752_v45 = vld [vmem:[%s3949_s30 + $0x8] ss:$8 sps:$4 sm:$0xff]   ;;  %v3307_v46 = vld [vmem:[%s3949_s30 + $0xc] sm:$0x1]  ;;  %p3774_p12 = pnand %p3773_p11, %p3918_p5 }
  0x2b   : > { %v3267_v11 = vcombine.low %v400_v63, %v414_v7  ;;  %v323_v13 = vrot.slane %v321_v1, 5  ;;  %v341_v14 = vshll.u32 %v294_v61, 16  ;;  %v334_v19 = vrot.slane %v332_v9, 4  ;;  %v3308_v47 = vld [vmem:[%s3949_s30 + $0x10] sm:$0xf]  ;;  %v3748_v59 = vld [vmem:[%s4867_s1 + $0x20] sm:$0xff]  }
  0x2c   : > { %v311_v18 = vrot.slane %v310_v8, 4  ;;  %v337_v20 = vrot.slane %v335_v10, 5  ;;  %v346_v21 = vshrl.u32 %v3999_v57, 16  ;;  %v329_v23 = vrot.slane %v327_v2, 5  ;;  %v3309_v49 = vld [vmem:[%s3949_s30 + $0x14] sm:$0x1]  ;;  %p3775_p13 = pneg %p3774_p12 }
  0x2d   : > { %3558 = vmatmul.mubr.msk.bf16.vlgmr.msra.gmra.mxu1 %vm444_vm2, %v3267_v11  ;;  %v324_v22 = vor.u32 %v323_v13, %v320_v0  ;;  %v349_v24 = vshll.u32 %v3999_v57, 16  ;;  %v355_v25 = vshll.u32 %v295_v62, 16  ;;  %v3274_v28 = vcombine.low %v3978_v31, %v281_v37  ;;  %v3310_v56 = vld [vmem:[%s3949_s30 + $0x18] sm:$0xf]  ;;  %v3312_v63 = vld [vmem:[%s3949_s30 + $0x20] sm:$0xf] }
  0x2e   : > { %3562 = vmatpush3.bf16.msra.mxu1 %v3939_v3  ;;  %v338_v26 = vor.u32 %v337_v20, %v334_v19  ;;  %v348_v27 = vrot.slane %v346_v21, 4  ;;  %v316_v29 = vsel %vm3982_vm3, %v311_v18, %v315_v12  ;;  %v343_v33 = vrot.slane %v341_v14, 5  ;;  %v3313_v0 = vld [vmem:[%s3949_s30 + $0x24] sm:$0x1]  ;;  %v3314_v11 = vld [vmem:[%s3949_s30 + $0x28] sm:$0xf] }
  0x2f   : > { %v325_v30 = vrot.slane %v324_v22, 4  ;;  %v351_v34 = vrot.slane %v349_v24, 5  ;;  %3563 = vmatprep.subr.bf16.mxu1 %v3747_v17  ;;  %3565 = vmatprep.mubr.msk.bf16.mxu1 %vm444_vm2, %v3274_v28  ;;  %v357_v37 = vrot.slane %v355_v25, 5  ;;  %v3275_v38 = vcombine.low %v3994_v52, %v3999_v57  ;;  %v3311_v57 = vld [vmem:[%s3949_s30 + $0x1c] sm:$0x1]  ;;  %s3776_s25 = sshll.u32 %s3836_s24, 4  ;;  %s3777_s25 = int_to_ptr.vmem [resolvable:$false] %s3776_s25 }
  0x30   : > { %v339_v36 = vrot.slane %v338_v26, 4  ;;  %v3276_v40 = vcombine.low %v3952_v5, %v3955_v6  ;;  %v779_v48 = vshrl.u32 %v3306_v42, 16  ;;  %v782_v5 = vshll.u32 %v3306_v42, 16  ;;  %v3315_v18 = vld [vmem:[%s3949_s30 + $0x2c] sm:$0x1]  ;;  %p3779_p0 = scmp.lt.s32.totalorder %s3196_s19, %s3777_s25 }
  0x31   : > { %v330_v3 = vsel %vm3982_vm3, %v325_v30, %v329_v23  ;;  %v352_v31 = vor.u32 %v351_v34, %v348_v27  ;;  %v788_v6 = vshll.u32 %v3307_v46, 16  ;;  %v793_v50 = vshrl.u32 %v3308_v47, 16  ;;  %v3316_v23 = vld [vmem:[%s3949_s30 + $0x30] sm:$0xf]  ;;  %v3753_v24 = vld [vmem:[%s3949_s30 + $0x18] ss:$8 sps:$4 sm:$0xff]  }
  0x32   : > { %v3264_v39 = vcombine.low %v316_v29, %v330_v3  ;;  %3564 = vmatpush3.bf16.msra.mxu1 %v3747_v17  ;;  %v344_v43 = vsel %vm3982_vm3, %v339_v36, %v343_v33  ;;  %v796_v51 = vshll.u32 %v3308_v47, 16  ;;  %v3277_v53 = vcombine.low %v3966_v15, %v3969_v16  ;;  %v3757_v28 = vld [vmem:[%s3949_s30 + $0x28] ss:$8 sps:$4 sm:$0xff]   ;;  %v3317_v33 = vld [vmem:[%s3949_s30 + $0x34] sm:$0x1] }
  0x33   : > { %v353_v44 = vrot.slane %v352_v31, 4  ;;  %3585 = vmatprep.subr.bf16.mxu1 %v3750_v35  ;;  %v781_v54 = vrot.slane %v779_v48, 4  ;;  %v802_v55 = vshll.u32 %v3309_v49, 16  ;;  %v784_v60 = vrot.slane %v782_v5, 5  ;;  %v3319_v42 = vld [vmem:[%s3949_s30 + $0x3c] sm:$0x1] }
  0x34   : > { %3553 = vmatprep.mubr.msk.bf16.mxu0 %vm444_vm2, %v3264_v39  ;;  %v790_v61 = vrot.slane %v788_v6, 5  ;;  %v795_v62 = vrot.slane %v793_v50, 4  ;;  %v798_v15 = vrot.slane %v796_v51, 5  ;;  %v807_v1 = vshrl.u32 %v3310_v56, 16  ;;  %v3320_v47 = vld [vmem:[%s3949_s30 + $0x40] sm:$0xf] }
  0x35   : > { %v358_v52 = vsel %vm3982_vm3, %v353_v44, %v357_v37  ;;  %3566 = vmatmul.mubr.msk.bf16.vlgmr.msra.gmra.mxu1 %vm444_vm2, %v3275_v38  ;;  %v804_v16 = vrot.slane %v802_v55, 5  ;;  %v810_v2 = vshll.u32 %v3310_v56, 16  ;;  %v785_v7 = vor.u32 %v784_v60, %v781_v54  ;;  %v3318_v38 = vld [vmem:[%s3949_s30 + $0x38] sm:$0xf]  ;;  %v3321_v5 = vld [vmem:[%s3949_s30 + $0x44] sm:$0x1] }
  0x36   : > { %v3265_v58 = vcombine.low %v344_v43, %v358_v52  ;;  %3586 = vmatpush3.bf16.msra.mxu1 %v3750_v35  ;;  %3569 = vmatprep.mubr.msk.bf16.mxu1 %vm444_vm2, %v3276_v40  ;;  %v816_v8 = vshll.u32 %v3311_v57, 16  ;;  %v821_v9 = vshrl.u32 %v3312_v63, 16  ;;  %v824_v10 = vshll.u32 %v3312_v63, 16  ;;  %v3758_v63 = vld [vmem:[%s3949_s30 + $0x38] ss:$8 sps:$4 sm:$0xff]   ;;  %s3778_s30 = scalar_lea.vmem %s3777_s25, 256 }
  0x37   : > { %3587 = vmatprep.subr.bf16.mxu1 %v3755_v41  ;;  %v799_v12 = vor.u32 %v798_v15, %v795_v62  ;;  %v809_v13 = vrot.slane %v807_v1, 4  ;;  %v812_v14 = vrot.slane %v810_v2, 5  ;;  %v830_v17 = vshll.u32 %v3313_v0, 16  ;;  %p3780_p1 = scmp.lt.s32.totalorder %s3778_s30, %s3772_s23 }
  0x38   : > { %3554 = vmatmul.mubr.msk.bf16.vlgmr.msra.gmra.mxu0 %vm444_vm2, %v3265_v58  ;;  %v786_v19 = vrot.slane %v785_v7, 4  ;;  %v818_v20 = vrot.slane %v816_v8, 5  ;;  %v823_v21 = vrot.slane %v821_v9, 4  ;;  %v826_v22 = vrot.slane %v824_v10, 5 }
  0x39   : > { %3574 = vmatpush3.bf16.msra.mxu0 %v3944_v4  ;;  %3577 = vmatprep.mubr.msk.bf16.mxu0 %vm444_vm2, %v3752_v45  ;;  %v800_v25 = vrot.slane %v799_v12, 4  ;;  %v813_v4 = vor.u32 %v812_v14, %v809_v13  ;;  %v832_v26 = vrot.slane %v830_v17, 5  ;;  %v835_v27 = vshrl.u32 %v3314_v11, 16  ;;  %p3781_p2 = por %p3780_p1, %p3779_p0 }
  0x3a   : > { %3575 = vmatprep.subr.bf16.mxu0 %v3748_v59  ;;  %3588 = vmatpush3.bf16.msra.mxu1 %v3755_v41  ;;  %v791_v29 = vsel %vm3982_vm3, %v786_v19, %v790_v61  ;;  %v827_v30 = vor.u32 %v826_v22, %v823_v21  ;;  %v838_v34 = vshll.u32 %v3314_v11, 16  ;;  %v844_v35 = vshll.u32 %v3315_v18, 16  ;;  %v3345_v22 = vld [vmem:[%s4869_s3 + $0x4] sm:$0xf] }
  0x3b   : > { %v805_v36 = vsel %vm3982_vm3, %v800_v25, %v804_v16  ;;  %v814_v3 = vrot.slane %v813_v4, 4  ;;  %v837_v31 = vrot.slane %v835_v27, 4  ;;  %v849_v37 = vshrl.u32 %v3316_v23, 16  ;;  %v3379_v25 = vld [vmem:[%s4869_s3 + $0xc] sm:$0xf]  ;;  %p3782_p3 = pnand %p3781_p2, %p3775_p13 }
  0x3c   : > { %v3326_v39 = vcombine.low %v791_v29, %v805_v36  ;;  %v828_v40 = vrot.slane %v827_v30, 4  ;;  %v840_v41 = vrot.slane %v838_v34, 5  ;;  %v852_v45 = vshll.u32 %v3316_v23, 16 }
  0x3d   : > { %3576 = vmatpush3.bf16.msra.mxu0 %v3748_v59  ;;  %3570 = vmatmul.mubr.msk.bf16.gmra.mxu1 %vm444_vm2, %v3277_v53  ;;  %v819_v43 = vsel %vm3982_vm3, %v814_v3, %v818_v20  ;;  %v851_v44 = vrot.slane %v849_v37, 4  ;;  %v858_v46 = vshll.u32 %v3317_v33, 16  ;;  %v863_v6 = vshrl.u32 %v3318_v38, 16  ;;  %v1240_v20 = vld [vmem:[%s4869_s3] sm:$0xf] }
  0x3e   : > { %3589 = vmatprep.mubr.msk.bf16.mxu1 %vm444_vm2, %v3326_v39  ;;  %v833_v48 = vsel %vm3982_vm3, %v828_v40, %v832_v26  ;;  %v841_v49 = vor.u32 %v840_v41, %v837_v31  ;;  %v866_v50 = vshll.u32 %v3318_v38, 16  ;;  %v846_v52 = vrot.slane %v844_v35, 5  ;;  %3692 = vmatprep.subr.msk.bf16.mxu1 %vm1388_vm6, %v1240_v20 }
  0x3f   : > { %v3327_v51 = vcombine.low %v819_v43, %v833_v48  ;;  %v854_v53 = vrot.slane %v852_v45, 5  ;;  %v872_v54 = vshll.u32 %v3319_v42, 16  ;;  %v865_v56 = vrot.slane %v863_v6, 4  ;;  %3691 = vmatprep.subr.msk.bf16.mxu0 %vm1388_vm6, %v3345_v22 }
  0x40   : > { %3578 = vmatmul.mubr.msk.bf16.vlgmr.msra.gmra.mxu0 %vm444_vm2, %v3753_v24  ;;  %v842_v55 = vrot.slane %v841_v49, 4  ;;  %v868_v57 = vrot.slane %v866_v50, 5  ;;  %v877_v58 = vshrl.u32 %v3320_v47, 16  ;;  %v860_v60 = vrot.slane %v858_v46, 5  ;;  %v3370_v24 = vld [vmem:[%s4869_s3 + $0x8] sm:$0xf] }
  0x41   : > { %3581 = vmatprep.mubr.msk.bf16.mxu0 %vm444_vm2, %v3757_v28  ;;  %v855_v59 = vor.u32 %v854_v53, %v851_v44  ;;  %v880_v61 = vshll.u32 %v3320_v47, 16  ;;  %v886_v62 = vshll.u32 %v3321_v5, 16  ;;  %v874_v2 = vrot.slane %v872_v54, 5 }
  0x42   : > { %v869_v15 = vor.u32 %v868_v57, %v865_v56  ;;  %v879_v16 = vrot.slane %v877_v58, 4  ;;  %v847_v0 = vsel %vm3982_vm3, %v842_v55, %v846_v52  ;;  %v3834_v19 = vmov 0  }
  0x43   : > { %v856_v1 = vrot.slane %v855_v59, 4  ;;  %v882_v7 = vrot.slane %v880_v61, 5  ;;  %v888_v11 = vrot.slane %v886_v62, 5  ;;  %1051 = vst.msk [vmem:[#allocation2 + $0x18] sm:$0xf] %vm1043_vm4, %v3834_v19  ;;  %3742 = vset.pattern.permute.xlu0 %v3834_v19  ;;  %v1490_v21 = vsel %vm1388_vm6, %v1240_v20, 0 }
  0x44   : > { %v870_v8 = vrot.slane %v869_v15, 4  ;;  %1052 = vst.msk [vmem:[#allocation2 + $0x1c] sm:$0x1] %vm1045_vm5, %v3834_v19  ;;  %1046 = vst.msk [vmem:[#allocation2 + $0x4] sm:$0x1] %vm1045_vm5, %v3834_v19  ;;  %v1390_v23 = vsel %vm1388_vm6, %v3345_v22, 0 }
  0x45   : > { %3590 = vmatmul.mubr.msk.bf16.vlgmr.msra.gmra.mxu1 %vm444_vm2, %v3327_v51  ;;  %v861_v9 = vsel %vm3982_vm3, %v856_v1, %v860_v60  ;;  %v883_v10 = vor.u32 %v882_v7, %v879_v16  ;;  %1044 = vst.msk [vmem:[#allocation2] sm:$0xf] %vm1043_vm4, %v3834_v19  ;;  %1047 = vst.msk [vmem:[#allocation2 + $0x8] sm:$0xf] %vm1043_vm4, %v3834_v19  ;;  %3598 = vmatpush3.bf16.msra.mxu0 %v1390_v23  ;;  %v4154_v60 = vld [vmem:[%s4869_s3 + $0x10] sm:$0xf] }
  0x46   : > { %v3328_v12 = vcombine.low %v847_v0, %v861_v9  ;;  %v875_v13 = vsel %vm3982_vm3, %v870_v8, %v874_v2  ;;  %1048 = vst.msk [vmem:[#allocation2 + $0xc] sm:$0x1] %vm1045_vm5, %v3834_v19  ;;  %1050 = vst.msk [vmem:[#allocation2 + $0x14] sm:$0x1] %vm1045_vm5, %v3834_v19  ;;  %3608 = vmatpush3.bf16.msra.mxu1 %v1490_v21  ;;  %3693 = vmatprep.subr.msk.bf16.mxu0 %vm1388_vm6, %v3370_v24  ;;  %v4159_v62 = vld [vmem:[%s4868_s2] ss:$0 sm:$0xff] }
  0x47   : > { %v884_v14 = vrot.slane %v883_v10, 4  ;;  %1049 = vst.msk [vmem:[#allocation2 + $0x10] sm:$0xf] %vm1043_vm4, %v3834_v19  ;;  %1053 = vst.msk [vmem:[#allocation2 + $0x20] sm:$0xf] %vm1043_vm4, %v3834_v19  ;;  %3694 = vmatprep.subr.msk.bf16.mxu1 %vm1388_vm6, %v3379_v25 }
  0x48   : > { %3582 = vmatmul.mubr.msk.bf16.gmra.mxu0 %vm444_vm2, %v3758_v63  ;;  %3593 = vmatprep.mubr.msk.bf16.mxu1 %vm444_vm2, %v3328_v12  ;;  %1054 = vst.msk [vmem:[#allocation2 + $0x24] sm:$0x1] %vm1045_vm5, %v3834_v19  ;;  %1056 = vst.msk [vmem:[#allocation2 + $0x2c] sm:$0x1] %vm1045_vm5, %v3834_v19  ;;  %v4168_v15 = vld [vmem:[%s4869_s3 + $0x14] sm:$0xf] }
  0x49   : > { %v889_v17 = vsel %vm3982_vm3, %v884_v14, %v888_v11  ;;  %1055 = vst.msk [vmem:[#allocation2 + $0x28] sm:$0xf] %vm1043_vm4, %v3834_v19  ;;  %1057 = vst.msk [vmem:[#allocation2 + $0x30] sm:$0xf] %vm1043_vm4, %v3834_v19  ;;  %v4175_v10 = vld [vmem:[%s4869_s3 + $0x18] sm:$0xf] }
  0x4a   : > { %v3329_v18 = vcombine.low %v875_v13, %v889_v17  ;;  %1058 = vst.msk [vmem:[#allocation2 + $0x34] sm:$0x1] %vm1045_vm5, %v3834_v19  ;;  %1060 = vst.msk [vmem:[#allocation2 + $0x3c] sm:$0x1] %vm1045_vm5, %v3834_v19  ;;  %v4180_v11 = vld [vmem:[%s4869_s3 + $0x1c] sm:$0xf] }
  0x4b   : > { %1059 = vst.msk [vmem:[#allocation2 + $0x38] sm:$0xf] %vm1043_vm4, %v3834_v19  ;;  %1061 = vst.msk [vmem:[#allocation2 + $0x40] sm:$0xf] %vm1043_vm4, %v3834_v19  ;;  %v4142_v41 = vld [vmem:[#allocation2 + $0x4] sm:$0x1] }
  0x4c   : > { %1062 = vst.msk [vmem:[#allocation2 + $0x44] sm:$0x1] %vm1045_vm5, %v3834_v19  ;;  %1064 = vst.msk [vmem:[#allocation2 + $0x4c] sm:$0x1] %vm1045_vm5, %v3834_v19  ;;  %v4136_v28 = vld [vmem:[#allocation2] sm:$0xf] }
  0x4d   : > { %3594 = vmatmul.mubr.msk.bf16.gmra.mxu1 %vm444_vm2, %v3329_v18  ;;  %1063 = vst.msk [vmem:[#allocation2 + $0x48] sm:$0xf] %vm1043_vm4, %v3834_v19  ;;  %v1250_v33 = vshrl.u32 %v4136_v28, 16  ;;  %v1253_v34 = vshll.u32 %v4136_v28, 16  ;;  %v1259_v44 = vshll.u32 %v4142_v41, 16  ;;  %v1586_v9 = vrot.slane %v4142_v41, 5 }
  0x4e   : > { %v4149_v56 = vld [vmem:[#allocation2] sm:$0xe]  ;;  %v4183_v14 = vsel %vm1388_vm6, %v3370_v24, 0  ;;  %v4186_v17 = vsel %vm1388_vm6, %v3379_v25, 0  ;;  %v4190_v18 = vsel %vm1388_vm6, %v4154_v60, 0  ;;  %v4195_v23 = vsel %vm1388_vm6, %v4168_v15, 0 }
  0x4f   : > { %v1252_v31 = vrot.slane %v1250_v33, 4  ;;  %v1255_v37 = vrot.slane %v1253_v34, 5  ;;  %v4147_v50 = vrot.slane %v1259_v44, 5  ;;  %v3362_v8 = vrot.slane %v4149_v56, 9 }
  0x50   : > { %v4200_v25 = vsel %vm1388_vm6, %v4175_v10, 0  ;;  %v4204_v33 = vsel %vm1388_vm6, %v4180_v11, 0  ;;  %vm1581_vm5 = vcmask 1042432  }
  0x51   : > { %v1256_v43 = vor.u32 %v1255_v37, %v1252_v31  ;;  %vm4332_vm8 = vmor %vm1581_vm5, %vm1582_vm7  ;;  %vm3169_vm5 = vcmask 1043459   ;;  %vm3171_vm7 = vcmask 1044484  }
  0x53   : > { %v4145_v6 = vrot.slane %v1256_v43, 4  ;;  %v4207_v37 = vld [vmem:[#allocation2 + $0x4c] sm:$0x1] }
  0x54   : > { %v2357_v46 = vld [vmem:[#allocation2 + $0x48] sm:$0xf] }
  0x55   : > { %v2458_v51 = vshrl.u32 %v2357_v46, 16  ;;  %v2461_v52 = vshll.u32 %v2357_v46, 16  ;;  %v1262_v63 = vsel %vm3982_vm3, %v4145_v6, %v4147_v50 }
  0x57   : > { %v2460_v16 = vrot.slane %v2458_v51, 4  ;;  %v2463_v0 = vrot.slane %v2461_v52, 5 }
  0x59   : > { %v2464_v34 = vor.u32 %v2463_v0, %v2460_v16 }
  0x5b   : > { %v4214_v52 = vrot.slane %v2464_v34, 4 }
  0xed   : > { %v4130_v4 = vpop.f32.mrf.mxu1 }
  0xef   : > { %v4132_v26 = vpop.f32.mrf.mxu1 }
  0xf1   : > { %v4134_v27 = vpop.f32.mrf.mxu1 }
  0xf3   : > { %v4138_v29 = vpop.f32.mrf.mxu1 }
  0xf5   : > { %v3567_v30 = vpop.f32.mrf.mxu1 }
  0xf7   : > { %v600_v35 = vpop.f32.mrf.mxu1 }
  0xf8   : > { %v3555_v36 = vpop.f32.mrf.mxu0 }
  0xf9   : > { %v3568_v3 = vpop.f32.mrf.mxu1  ;;  %v609_v48 = vadd.f32 %v3567_v30, %v3555_v36 }
  0xfa   : > { %v491_v38 = vpop.f32.mrf.mxu0 }
  0xfb   : > { %v603_v39 = vpop.f32.mrf.mxu1  ;;  %v601_v53 = vadd.f32 %v600_v35, %v491_v38 }
  0xfc   : > { %v3556_v40 = vpop.f32.mrf.mxu0 }
  0xfd   : > { %v3571_v42 = vpop.f32.mrf.mxu1  ;;  %v612_v58 = vadd.f32 %v3568_v3, %v3556_v40 }
  0xfe   : > { %v494_v45 = vpop.f32.mrf.mxu0  ;;  %v625_v30 = vadd.f32 %v3571_v42, %v4130_v4  ;;  %v2467_v42 = vshll.u32 %v4207_v37, 16 }
  0xff   : > { %v616_v47 = vpop.f32.mrf.mxu1  ;;  %v604_v12 = vadd.f32 %v603_v39, %v494_v45 }
 0x100   : > { %v3579_v49 = vpop.f32.mrf.mxu0  ;;  %v617_v4 = vadd.f32 %v616_v47, %v4132_v26 }
 0x101   : > { %v3572_v5 = vpop.f32.mrf.mxu1  ;;  %v756_v57 = vadd.f32 %v3579_v49, %v609_v48 }
 0x102   : > { %v723_v54 = vpop.f32.mrf.mxu0  ;;  %v628_v39 = vadd.f32 %v3572_v5, %v4134_v27 }
 0x103   : > { %v619_v55 = vpop.f32.mrf.mxu1  ;;  %v754_v1 = vadd.f32 %v723_v54, %v601_v53 }
 0x104   : > { %v3580_v59 = vpop.f32.mrf.mxu0  ;;  %v620_v48 = vadd.f32 %v619_v55, %v4138_v29 }
 0x105   : > { %v3591_v61 = vpop.f32.mrf.mxu1  ;;  %v757_v19 = vadd.f32 %v3580_v59, %v612_v58 }
 0x106   : > { %v726_v2 = vpop.f32.mrf.mxu0  ;;  %v998_v7 = vadd.f32 %v3591_v61, %v756_v57 }
 0x107   : > { %v965_v13 = vpop.f32.mrf.mxu1  ;;  %v755_v38 = vadd.f32 %v726_v2, %v604_v12  ;;  %v1196_v2 = vld [vmem:[#allocation2 + $0x18] sm:$0xf] }
 0x108   : > { %v3583_v20 = vpop.f32.mrf.mxu0  ;;  %v1013_v21 = vadd.f32 %v4159_v62, %v998_v7  ;;  %v996_v22 = vadd.f32 %v965_v13, %v754_v1 }
 0x109   : > { %v3592_v24 = vpop.f32.mrf.mxu1  ;;  %v760_v53 = vadd.f32 %v3583_v20, %v625_v30  ;;  %v1199_v20 = vld [vmem:[#allocation2 + $0x1c] sm:$0x1] }
 0x10a   : > { %v739_v35 = vpop.f32.mrf.mxu0  ;;  %vm1021_vm9 = vcmp.ge.f32.partialorder %v1013_v21, 0.0  ;;  %v1029_v36 = vmul.f32 0.1, %v1013_v21  ;;  %v1011_v3 = vadd.f32 %v4159_v62, %v996_v22  ;;  %v999_v31 = vadd.f32 %v3592_v24, %v757_v19 }
 0x10b   : > { %v968_v40 = vpop.f32.mrf.mxu1  ;;  %v758_v47 = vadd.f32 %v739_v35, %v617_v4 }
 0x10c   : > { %v3584_v43 = vpop.f32.mrf.mxu0  ;;  %v1037_v44 = vsel %vm1021_vm9, %v1013_v21, %v1029_v36  ;;  %vm1019_vm10 = vcmp.ge.f32.partialorder %v1011_v3, 0.0  ;;  %v1027_v45 = vmul.f32 0.1, %v1011_v3  ;;  %v1014_v46 = vadd.f32 %v4159_v62, %v999_v31  ;;  %v1181_v36 = vld [vmem:[#allocation2 + $0x8] sm:$0xf] }
 0x10d   : > { %v3474_v49 = vpack.c.bf16 %v1037_v44, %v1037_v44  ;;  %v997_v51 = vadd.f32 %v968_v40, %v755_v38  ;;  %v3595_v27 = vpop.f32.mrf.mxu1  ;;  %v761_v5 = vadd.f32 %v3584_v43, %v628_v39  ;;  %v1187_v31 = vld [vmem:[#allocation2 + $0xc] sm:$0x1] }
 0x10e   : > { %v1035_v54 = vsel %vm1019_vm10, %v1011_v3, %v1027_v45  ;;  %vm1022_vm11 = vcmp.ge.f32.partialorder %v1014_v46, 0.0  ;;  %v1030_v26 = vmul.f32 0.1, %v1014_v46  ;;  %v1002_v0 = vadd.f32 %v3595_v27, %v760_v53  ;;  %v742_v43 = vpop.f32.mrf.mxu0 }
 0x10f   : > { %v1114_v57 = vshrl.u32 %v3474_v49, 16  ;;  %v3472_v58 = vpack.c.bf16 %v1035_v54, %v1035_v54  ;;  %v1117_v59 = vshll.u32 %v3474_v49, 16  ;;  %v1012_v16 = vadd.f32 %v4159_v62, %v997_v51  ;;  %v981_v1 = vpop.f32.mrf.mxu1 }
 0x110   : > { %v1038_v61 = vsel %vm1022_vm11, %v1014_v46, %v1030_v26  ;;  %v1017_v22 = vadd.f32 %v4159_v62, %v1002_v0  ;;  %v1000_v30 = vadd.f32 %v981_v1, %v758_v47 }
 0x111   : > { %v1116_v29 = vrot.slane %v1114_v57, 7  ;;  %v1098_v7 = vshrl.u32 %v3472_v58, 16  ;;  %v1101_v12 = vshll.u32 %v3472_v58, 16  ;;  %v3475_v13 = vpack.c.bf16 %v1038_v61, %v1038_v61  ;;  %v3596_v40 = vpop.f32.mrf.mxu1  ;;  %v1202_v57 = vld [vmem:[#allocation2 + $0x20] sm:$0xf] }
 0x112   : > { %vm1020_vm14 = vcmp.ge.f32.partialorder %v1012_v16, 0.0  ;;  %v1028_v21 = vmul.f32 0.1, %v1012_v16  ;;  %vm1025_vm15 = vcmp.ge.f32.partialorder %v1017_v22, 0.0  ;;  %v1033_v39 = vmul.f32 0.1, %v1017_v22 }
 0x113   : > { %v1119_v24 = vor.u32 %v1117_v59, %v1116_v29  ;;  %v1120_v34 = vrot.slane %v1116_v29, 4  ;;  %v1100_v35 = vrot.slane %v1098_v7, 7  ;;  %v1122_v3 = vshrl.u32 %v3475_v13, 16  ;;  %v1205_v58 = vld [vmem:[#allocation2 + $0x24] sm:$0x1] }
 0x114   : > { %v1125_v38 = vshll.u32 %v3475_v13, 16  ;;  %v1036_v4 = vsel %vm1020_vm14, %v1012_v16, %v1028_v21  ;;  %v1041_v54 = vsel %vm1025_vm15, %v1017_v22, %v1033_v39  ;;  %v1015_v26 = vadd.f32 %v4159_v62, %v1000_v30  ;;  %v1193_v30 = vld [vmem:[#allocation2 + $0x14] sm:$0x1] }
 0x115   : > { %v1197_v44 = vsel %vm4219_vm12, %v1119_v24, %v1196_v2  ;;  %v1200_v45 = vsel %vm4225_vm13, %v1120_v34, %v1199_v20  ;;  %v1103_v46 = vor.u32 %v1101_v12, %v1100_v35  ;;  %v1104_v49 = vrot.slane %v1100_v35, 4  ;;  %v984_v2 = vpop.f32.mrf.mxu1 }
 0x116   : > { %1198 = vst [vmem:[#allocation2 + $0x18] sm:$0xf] %v1197_v44  ;;  %1201 = vst [vmem:[#allocation2 + $0x1c] sm:$0x1] %v1200_v45  ;;  %v1124_v51 = vrot.slane %v1122_v3, 7  ;;  %v3473_v53 = vpack.c.bf16 %v1036_v4, %v1036_v4  ;;  %v3478_v59 = vpack.c.bf16 %v1041_v54, %v1041_v54  ;;  %v1003_v61 = vadd.f32 %v3596_v40, %v761_v5 }
 0x117   : > { %v1182_v27 = vsel %vm4219_vm12, %v1103_v46, %v1181_v36  ;;  %v1188_v47 = vsel %vm4225_vm13, %v1104_v49, %v1187_v31  ;;  %v759_v16 = vadd.f32 %v742_v43, %v620_v48  ;;  %vm1023_vm1 = vcmp.ge.f32.partialorder %v1015_v26, 0.0  ;;  %v1190_v5 = vld [vmem:[#allocation2 + $0x10] sm:$0xf]  ;;  %v1223_v4 = vld [vmem:[#allocation2 + $0x3c] sm:$0x1] }
 0x118   : > { %1183 = vst [vmem:[#allocation2 + $0x8] sm:$0xf] %v1182_v27  ;;  %1189 = vst [vmem:[#allocation2 + $0xc] sm:$0x1] %v1188_v47  ;;  %v1127_v0 = vor.u32 %v1125_v38, %v1124_v51  ;;  %v1128_v1 = vrot.slane %v1124_v51, 4  ;;  %v1106_v29 = vshrl.u32 %v3473_v53, 16  ;;  %v1018_v48 = vadd.f32 %v4159_v62, %v1003_v61 }
 0x119   : > { %v1109_v7 = vshll.u32 %v3473_v53, 16  ;;  %v1146_v12 = vshrl.u32 %v3478_v59, 16  ;;  %v1031_v13 = vmul.f32 0.1, %v1015_v26  ;;  %v1149_v34 = vshll.u32 %v3478_v59, 16 }
 0x11a   : > { %v1203_v20 = vsel %vm4219_vm12, %v1127_v0, %v1202_v57  ;;  %v1206_v21 = vsel %vm4225_vm13, %v1128_v1, %v1205_v58  ;;  %v1108_v22 = vrot.slane %v1106_v29, 7  ;;  %v1001_v36 = vadd.f32 %v984_v2, %v759_v16  ;;  %v1220_v38 = vld [vmem:[#allocation2 + $0x38] sm:$0xf]  ;;  %v1208_v47 = vld [vmem:[#allocation2 + $0x28] sm:$0xf] }
 0x11b   : > { %1204 = vst [vmem:[#allocation2 + $0x20] sm:$0xf] %v1203_v20  ;;  %1207 = vst [vmem:[#allocation2 + $0x24] sm:$0x1] %v1206_v21  ;;  %v1148_v24 = vrot.slane %v1146_v12, 7  ;;  %v1039_v35 = vsel %vm1023_vm1, %v1015_v26, %v1031_v13  ;;  %vm1026_vm2 = vcmp.ge.f32.partialorder %v1018_v48, 0.0 }
 0x11c   : > { %v1111_v3 = vor.u32 %v1109_v7, %v1108_v22  ;;  %v1112_v31 = vrot.slane %v1108_v22, 4  ;;  %v3476_v39 = vpack.c.bf16 %v1039_v35, %v1039_v35  ;;  %v1034_v44 = vmul.f32 0.1, %v1018_v48  ;;  %v1211_v0 = vld [vmem:[#allocation2 + $0x2c] sm:$0x1] }
 0x11d   : > { %v1151_v40 = vor.u32 %v1149_v34, %v1148_v24  ;;  %v1152_v43 = vrot.slane %v1148_v24, 4  ;;  %v1016_v45 = vadd.f32 %v4159_v62, %v1001_v36  ;;  %v4249_v54 = vld [vmem:[#allocation2 + $0x18] sm:$0xf] }
 0x11e   : > { %v1191_v46 = vsel %vm4219_vm12, %v1111_v3, %v1190_v5  ;;  %v1194_v49 = vsel %vm4225_vm13, %v1112_v31, %v1193_v30  ;;  %v1130_v51 = vshrl.u32 %v3476_v39, 16  ;;  %v1133_v53 = vshll.u32 %v3476_v39, 16  ;;  %v1229_v3 = vld [vmem:[#allocation2 + $0x44] sm:$0x1] }
 0x11f   : > { %1192 = vst [vmem:[#allocation2 + $0x10] sm:$0xf] %v1191_v46  ;;  %1195 = vst [vmem:[#allocation2 + $0x14] sm:$0x1] %v1194_v49  ;;  %v1221_v26 = vsel %vm4219_vm12, %v1151_v40, %v1220_v38  ;;  %v1224_v27 = vsel %vm4225_vm13, %v1152_v43, %v1223_v4  ;;  %v1042_v62 = vsel %vm1026_vm2, %v1018_v48, %v1034_v44  ;;  %vm1024_vm4 = vcmp.ge.f32.partialorder %v1016_v45, 0.0 }
 0x120   : > { %v1233_v57 = vld [vmem:[#allocation2 + $0x8] sm:$0xf]  ;;  %1222 = vst [vmem:[#allocation2 + $0x38] sm:$0xf] %v1221_v26  ;;  %1225 = vst [vmem:[#allocation2 + $0x3c] sm:$0x1] %v1224_v27  ;;  %v3479_v59 = vpack.c.bf16 %v1042_v62, %v1042_v62 }
 0x121   : > { %v1132_v58 = vrot.slane %v1130_v51, 7  ;;  %v1032_v61 = vmul.f32 0.1, %v1016_v45  ;;  %v1264_v16 = vshrl.u32 %v1233_v57, 16  ;;  %v1267_v1 = vshll.u32 %v1233_v57, 16 }
 0x122   : > { %v3354_v29 = vcombine.low %v4136_v28, %v1233_v57  ;;  %v1292_v2 = vshrl.u32 %v4249_v54, 16  ;;  %v1295_v7 = vshll.u32 %v4249_v54, 16  ;;  %v1154_v20 = vshrl.u32 %v3479_v59, 16  ;;  %v4258_v22 = vld [vmem:[#allocation2 + $0x20] sm:$0xf] }
 0x123   : > { %v1135_v12 = vor.u32 %v1133_v53, %v1132_v58  ;;  %v1136_v13 = vrot.slane %v1132_v58, 4  ;;  %v1157_v21 = vshll.u32 %v3479_v59, 16  ;;  %v1226_v48 = vld [vmem:[#allocation2 + $0x40] sm:$0xf]  ;;  %v1040_v5 = vsel %vm1024_vm4, %v1016_v45, %v1032_v61  ;;  %v4270_v40 = vld [vmem:[#allocation2 + $0xc] sm:$0x1] }
 0x124   : > { %v1266_v30 = vrot.slane %v1264_v16, 4  ;;  %v1269_v24 = vrot.slane %v1267_v1, 5  ;;  %3609 = vmatprep.mubr.msk.bf16.mxu1 %vm1375_vm0, %v3354_v29  ;;  %v4262_v34 = vrot.slane %v1292_v2, 4  ;;  %v1156_v36 = vrot.slane %v1154_v20, 7  ;;  %v1214_v53 = vld [vmem:[#allocation2 + $0x30] sm:$0xf] }
 0x125   : > { %v1209_v28 = vsel %vm4219_vm12, %v1135_v12, %v1208_v47  ;;  %v1212_v35 = vsel %vm4225_vm13, %v1136_v13, %v1211_v0  ;;  %v3477_v31 = vpack.c.bf16 %v1040_v5, %v1040_v5  ;;  %v1297_v38 = vrot.slane %v1295_v7, 5  ;;  %v1217_v1 = vld [vmem:[#allocation2 + $0x34] sm:$0x1]  ;;  %v4286_v5 = vld [vmem:[#allocation2 + $0x1c] sm:$0x1] }
 0x126   : > { %1210 = vst [vmem:[#allocation2 + $0x28] sm:$0xf] %v1209_v28  ;;  %1213 = vst [vmem:[#allocation2 + $0x2c] sm:$0x1] %v1212_v35  ;;  %v1306_v4 = vshrl.u32 %v4258_v22, 16  ;;  %v1309_v39 = vshll.u32 %v4258_v22, 16  ;;  %v1270_v43 = vor.u32 %v1269_v24, %v1266_v30  ;;  %v1159_v44 = vor.u32 %v1157_v21, %v1156_v36 }
 0x127   : > { %v1160_v45 = vrot.slane %v1156_v36, 4  ;;  %v1138_v46 = vshrl.u32 %v3477_v31, 16  ;;  %v1141_v49 = vshll.u32 %v3477_v31, 16  ;;  %v1234_v51 = vld [vmem:[#allocation2 + $0x10] sm:$0xf]  ;;  %v1273_v7 = vshll.u32 %v4270_v40, 16 }
 0x128   : > { %v1278_v26 = vshrl.u32 %v1234_v51, 16  ;;  %v1281_v27 = vshll.u32 %v1234_v51, 16  ;;  %v3355_v47 = vcombine.low %v1234_v51, %v4249_v54  ;;  %v1308_v62 = vrot.slane %v1306_v4, 4  ;;  %v4273_v57 = vld [vmem:[#allocation2 + $0x38] sm:$0xf] }
 0x129   : > { %v1227_v58 = vsel %vm4219_vm12, %v1159_v44, %v1226_v48  ;;  %v1230_v59 = vsel %vm4225_vm13, %v1160_v45, %v1229_v3  ;;  %v1140_v61 = vrot.slane %v1138_v46, 7  ;;  %v1311_v16 = vrot.slane %v1309_v39, 5  ;;  %v4279_v0 = vld [vmem:[#allocation2 + $0x14] sm:$0x1]  ;;  %v4296_v4 = vld [vmem:[#allocation2 + $0x24] sm:$0x1] }
 0x12a   : > { %1228 = vst [vmem:[#allocation2 + $0x40] sm:$0xf] %v1227_v58  ;;  %1231 = vst [vmem:[#allocation2 + $0x44] sm:$0x1] %v1230_v59  ;;  %v1280_v29 = vrot.slane %v1278_v26, 4  ;;  %v1283_v2 = vrot.slane %v1281_v27, 5  ;;  %3610 = vmatmul.mubr.msk.bf16.vlgmr.msra.gmra.mxu1 %vm1375_vm0, %v3355_v47  ;;  %v1298_v28 = vor.u32 %v1297_v38, %v4262_v34 }
 0x12b   : > { %v1271_v54 = vrot.slane %v1270_v43, 4  ;;  %v1143_v12 = vor.u32 %v1141_v49, %v1140_v61  ;;  %v1144_v13 = vrot.slane %v1140_v61, 4  ;;  %v1348_v20 = vshrl.u32 %v4273_v57, 16  ;;  %3628 = vmatpush3.bf16.msra.mxu1 %v4186_v17  ;;  %v1558_v50 = vld [vmem:[#allocation2 + $0x8] sm:$0xe] }
 0x12c   : > { %v1351_v21 = vshll.u32 %v4273_v57, 16  ;;  %v1275_v48 = vrot.slane %v1273_v7, 5  ;;  %v1284_v30 = vor.u32 %v1283_v2, %v1280_v29  ;;  %v1287_v24 = vshll.u32 %v4279_v0, 16  ;;  %3696 = vmatprep.subr.msk.bf16.mxu1 %vm1388_vm6, %v4168_v15 }
 0x12d   : > { %v1215_v35 = vsel %vm4219_vm12, %v1143_v12, %v1214_v53  ;;  %v1218_v36 = vsel %vm4225_vm13, %v1144_v13, %v1217_v1  ;;  %v1237_v17 = vld [vmem:[#allocation2 + $0x28] sm:$0xf]  ;;  %v1350_v3 = vrot.slane %v1348_v20, 4  ;;  %v4301_v38 = vld [vmem:[#allocation2 + $0x2c] sm:$0x1]  ;;  %v1299_v45 = vrot.slane %v1298_v28, 4 }
 0x12e   : > { %v1353_v31 = vrot.slane %v1351_v21, 5  ;;  %1216 = vst [vmem:[#allocation2 + $0x30] sm:$0xf] %v1215_v35  ;;  %1219 = vst [vmem:[#allocation2 + $0x34] sm:$0x1] %v1218_v36  ;;  %v1320_v39 = vshrl.u32 %v1237_v17, 16  ;;  %v3356_v34 = vcombine.low %v4258_v22, %v1237_v17  ;;  %v1276_v15 = vsel %vm3982_vm3, %v1271_v54, %v1275_v48 }
 0x12f   : > { %v1323_v43 = vshll.u32 %v1237_v17, 16  ;;  %v3346_v55 = vcombine.low %v1262_v63, %v1276_v15  ;;  %v1285_v19 = vrot.slane %v1284_v30, 4  ;;  %v1289_v44 = vrot.slane %v1287_v24, 5  ;;  %v4310_v53 = vld [vmem:[#allocation2 + $0x3c] sm:$0x1] }
 0x130   : > { %v1322_v46 = vrot.slane %v1320_v39, 4  ;;  %3613 = vmatprep.mubr.msk.bf16.mxu1 %vm1375_vm0, %v3356_v34  ;;  %v1301_v22 = vshll.u32 %v4286_v5, 16  ;;  %v1312_v51 = vor.u32 %v1311_v16, %v1308_v62  ;;  %v1315_v26 = vshll.u32 %v4296_v4, 16  ;;  %v1559_v12 = vld [vmem:[#allocation2 + $0x10] sm:$0xe] }
 0x131   : > { %v1325_v49 = vrot.slane %v1323_v43, 5  ;;  %3599 = vmatprep.mubr.msk.bf16.mxu0 %vm1375_vm0, %v3346_v55  ;;  %v1329_v27 = vshll.u32 %v4301_v38, 16  ;;  %v1354_v6 = vor.u32 %v1353_v31, %v1350_v3  ;;  %v1290_v63 = vsel %vm3982_vm3, %v1285_v19, %v1289_v44  ;;  %v1560_v13 = vld [vmem:[#allocation2 + $0x18] sm:$0xe]  ;;  %v3763_v48 = vld [vmem:[#allocation2 + $0x8] ss:$8 sps:$4 sm:$0xff]  }
 0x132   : > { %v1303_v47 = vrot.slane %v1301_v22, 5  ;;  %v1313_v58 = vrot.slane %v1312_v51, 4  ;;  %v1317_v61 = vrot.slane %v1315_v26, 5  ;;  %v1357_v62 = vshll.u32 %v4310_v53, 16  ;;  %v4336_v3 = vld [vmem:[#allocation2 + $0xc] sm:$0x1] }
 0x133   : > { %v1326_v59 = vor.u32 %v1325_v49, %v1322_v46  ;;  %v1331_v1 = vrot.slane %v1329_v27, 5  ;;  %v4317_v29 = vrot.slane %v1354_v6, 4  ;;  %v3363_v54 = vrot.slane %v1558_v50, 9  ;;  %v4338_v31 = vld [vmem:[#allocation2 + $0x14] sm:$0x1] }
 0x134   : > { %v1304_v16 = vsel %vm3982_vm3, %v1299_v45, %v1303_v47  ;;  %v1590_v7 = vrot.slane %v4270_v40, 5  ;;  %v1318_v30 = vsel %vm3982_vm3, %v1313_v58, %v1317_v61  ;;  %v1359_v34 = vrot.slane %v1357_v62, 5  ;;  %v2066_v15 = vld [vmem:[#allocation2 + $0x8] sm:$0xe]  ;;  %v2067_v55 = vld [vmem:[#allocation2 + $0x10] sm:$0xe] }
 0x135   : > { %v1327_v2 = vrot.slane %v1326_v59, 4  ;;  %v1238_v20 = vld [vmem:[#allocation2 + $0x30] sm:$0xf]  ;;  %v3347_v21 = vcombine.low %v1290_v63, %v1304_v16  ;;  %v4325_v24 = vld [vmem:[#allocation2 + $0x34] sm:$0x1]  ;;  %v3364_v46 = vrot.slane %v1559_v12, 9 }
 0x136   : > { %v1334_v28 = vshrl.u32 %v1238_v20, 16  ;;  %v1337_v35 = vshll.u32 %v1238_v20, 16  ;;  %v3357_v36 = vcombine.low %v1238_v20, %v4273_v57  ;;  %v1343_v43 = vshll.u32 %v4325_v24, 16  ;;  %v1561_v49 = vld [vmem:[#allocation2 + $0x20] sm:$0xe] }
 0x137   : > { %v1332_v17 = vsel %vm3982_vm3, %v1327_v2, %v1331_v1  ;;  %3600 = vmatmul.mubr.msk.bf16.vlgmr.msra.gmra.mxu0 %vm1375_vm0, %v3347_v21  ;;  %v4348_v57 = vsel %vm4332_vm8, %v3362_v8, %v1586_v9  ;;  %v1591_v45 = vsel %vm4332_vm8, %v3363_v54, %v1590_v7  ;;  %v1360_v41 = vsel %vm3982_vm3, %v4317_v29, %v1359_v34  ;;  %v1562_v22 = vld [vmem:[#allocation2 + $0x28] sm:$0xe]  ;;  %v4364_v6 = vld [vmem:[#allocation2 + $0x1c] sm:$0x1]  ;;  %v4372_v47 = vld [vmem:[#allocation2 + $0x24] sm:$0x1] }
 0x138   : > { %v3348_v39 = vcombine.low %v1318_v30, %v1332_v17  ;;  %v1336_v19 = vrot.slane %v1334_v28, 4  ;;  %v1339_v44 = vrot.slane %v1337_v35, 5  ;;  %3614 = vmatmul.mubr.msk.bf16.gmra.mxu1 %vm1375_vm0, %v3357_v36  ;;  %3618 = vmatpush3.bf16.msra.mxu0 %v4183_v14  ;;  %v1594_v56 = vrot.slane %v4279_v0, 5  ;;  %v2068_v58 = vld [vmem:[#allocation2 + $0x18] sm:$0xe] }
 0x139   : > { %3629 = vmatprep.mubr.msk.bf16.mxu1 %vm1375_vm0, %v3763_v48  ;;  %v3365_v8 = vrot.slane %v1560_v13, 9  ;;  %v1598_v9 = vrot.slane %v4286_v5, 5  ;;  %3695 = vmatprep.subr.msk.bf16.mxu0 %vm1388_vm6, %v4154_v60  ;;  %v3397_v51 = vrot.slane %v2066_v15, 9  ;;  %v2092_v26 = vrot.slane %v4336_v3, 5  ;;  %v3764_v59 = vld [vmem:[#allocation2 + $0x18] ss:$8 sps:$4 sm:$0xff]  }
 0x13a   : > { %3603 = vmatprep.mubr.msk.bf16.mxu0 %vm1375_vm0, %v3348_v39  ;;  %v1340_v14 = vor.u32 %v1339_v44, %v1336_v19  ;;  %v3398_v27 = vrot.slane %v2067_v55, 9  ;;  %v1345_v50 = vrot.slane %v1343_v43, 5  ;;  %v3371_v63 = vcombine.low %v4348_v57, %v1591_v45  ;;  %v2069_v62 = vld [vmem:[#allocation2 + $0x20] sm:$0xe]  ;;  %v3765_v16 = vld [vmem:[#allocation2 + $0x28] ss:$8 sps:$4 sm:$0xff]  }
 0x13b   : > { %v4369_v0 = vsel %vm4332_vm8, %v3364_v46, %v1594_v56  ;;  %v2096_v5 = vrot.slane %v4338_v31, 5  ;;  %v4376_v61 = vsel %vm4332_vm8, %v3365_v8, %v1598_v9  ;;  %v3366_v1 = vrot.slane %v1561_v49, 9  ;;  %v1563_v13 = vld [vmem:[#allocation2 + $0x30] sm:$0xe]  ;;  %v1564_v30 = vld [vmem:[#allocation2 + $0x38] sm:$0xe] }
 0x13c   : > { %v1341_v60 = vrot.slane %v1340_v14, 4  ;;  %v1602_v29 = vrot.slane %v4296_v4, 5  ;;  %v3372_v2 = vcombine.low %v4369_v0, %v4376_v61  ;;  %v3367_v7 = vrot.slane %v1562_v22, 9  ;;  %v4393_v28 = vld [vmem:[#allocation2 + $0x2c] sm:$0x1] }
 0x13d   : > { %v4383_v54 = vsel %vm4332_vm8, %v3398_v27, %v2096_v5  ;;  %v1606_v12 = vrot.slane %v4301_v38, 5  ;;  %v4390_v21 = vsel %vm4332_vm8, %v3397_v51, %v2092_v26  ;;  %v3399_v4 = vrot.slane %v2068_v58, 9  ;;  %v2070_v39 = vld [vmem:[#allocation2 + $0x28] sm:$0xe]  ;;  %v2071_v43 = vld [vmem:[#allocation2 + $0x30] sm:$0xe] }
 0x13e   : > { %v1346_v20 = vsel %vm3982_vm3, %v1341_v60, %v1345_v50  ;;  %v2100_v48 = vrot.slane %v4364_v6, 5  ;;  %v3400_v38 = vrot.slane %v2069_v62, 9  ;;  %v2104_v17 = vrot.slane %v4372_v47, 5  ;;  %v4406_v19 = vld [vmem:[#allocation2 + $0x34] sm:$0x1] }
 0x13f   : > { %v3349_v35 = vcombine.low %v1346_v20, %v1360_v41  ;;  %v4397_v36 = vsel %vm4332_vm8, %v3367_v7, %v1606_v12  ;;  %v3406_v34 = vcombine.low %v4390_v21, %v4383_v54  ;;  %v1603_v57 = vsel %vm4332_vm8, %v3366_v1, %v1602_v29  ;;  %v1836_v44 = vld [vmem:[#allocation2 + $0x8] sm:$0xf]  ;;  %v1838_v56 = vld [vmem:[#allocation2 + $0x10] sm:$0xf]  ;;  %v4423_v14 = vld [vmem:[#allocation2 + $0x3c] sm:$0x1] }
 0x140   : > { %3630 = vmatmul.mubr.msk.bf16.vlgmr.msra.gmra.mxu1 %vm1375_vm0, %v3764_v59  ;;  %v3368_v15 = vrot.slane %v1563_v13, 9  ;;  %v1610_v55 = vrot.slane %v4325_v24, 5  ;;  %v3373_v45 = vcombine.low %v1603_v57, %v4397_v36  ;;  %v4413_v46 = vsel %vm4332_vm8, %v3400_v38, %v2104_v17  ;;  %v4430_v50 = vld [vmem:[#allocation2 + $0x44] sm:$0x1]  ;;  %v2072_v59 = vld [vmem:[#allocation2 + $0x38] sm:$0xe] }
 0x141   : > { %3604 = vmatmul.mubr.msk.bf16.gmra.mxu0 %vm1375_vm0, %v3349_v35  ;;  %3633 = vmatprep.mubr.msk.bf16.mxu1 %vm1375_vm0, %v3765_v16  ;;  %v3369_v49 = vrot.slane %v1564_v30, 9  ;;  %v1614_v41 = vrot.slane %v4310_v53, 5  ;;  %v4420_v24 = vsel %vm4332_vm8, %v3399_v4, %v2100_v48  ;;  %v3401_v8 = vrot.slane %v2070_v39, 9  ;;  %v2073_v60 = vld [vmem:[#allocation2 + $0x40] sm:$0xe] }
 0x142   : > { %3619 = vmatprep.mubr.msk.bf16.mxu0 %vm1375_vm0, %v3371_v63  ;;  %3648 = vmatpush3.bf16.msra.mxu1 %v4195_v23  ;;  %v2108_v9 = vrot.slane %v4393_v28, 5  ;;  %v3402_v22 = vrot.slane %v2071_v43, 9  ;;  %v4427_v51 = vsel %vm4332_vm8, %v3368_v15, %v1610_v55  ;;  %v2112_v53 = vrot.slane %v4406_v19, 5  ;;  %v3766_v54 = vld [vmem:[#allocation2 + $0x38] ss:$8 sps:$4 sm:$0xff]  }
 0x143   : > { %v1853_v26 = vshrl.u32 %v1836_v44, 16  ;;  %v1856_v27 = vshll.u32 %v1836_v44, 16  ;;  %3698 = vmatprep.subr.msk.bf16.mxu1 %vm1388_vm6, %v4180_v11  ;;  %v3407_v23 = vcombine.low %v4420_v24, %v4413_v46  ;;  %v4438_v63 = vsel %vm4332_vm8, %v3369_v49, %v1614_v41  ;;  %v1840_v11 = vld [vmem:[#allocation2 + $0x18] sm:$0xf]  ;;  %v1842_v30 = vld [vmem:[#allocation2 + $0x20] sm:$0xf] }
 0x144   : > { %v1862_v5 = vshll.u32 %v4336_v3, 16  ;;  %v1867_v58 = vshrl.u32 %v1838_v56, 16  ;;  %v4443_v1 = vsel %vm4332_vm8, %v3402_v22, %v2112_v53  ;;  %v1870_v16 = vshll.u32 %v1838_v56, 16  ;;  %v2343_v41 = vld [vmem:[#allocation2 + $0x10] sm:$0xf] }
 0x145   : > { %v1855_v29 = vrot.slane %v1853_v26, 4  ;;  %v1858_v62 = vrot.slane %v1856_v27, 5  ;;  %v3374_v7 = vcombine.low %v4427_v51, %v4438_v63  ;;  %v2109_v12 = vsel %vm4332_vm8, %v3401_v8, %v2108_v9  ;;  %v4477_v22 = vld [vmem:[#allocation2 + $0x1c] sm:$0x1] }
 0x146   : > { %v1869_v13 = vrot.slane %v1867_v58, 4  ;;  %v1876_v3 = vshll.u32 %v4338_v31, 16  ;;  %v1872_v21 = vrot.slane %v1870_v16, 5  ;;  %v3403_v4 = vrot.slane %v2072_v59, 9 }
 0x147   : > { %v1859_v20 = vor.u32 %v1858_v62, %v1855_v29  ;;  %v2116_v48 = vrot.slane %v4423_v14, 5  ;;  %v3408_v35 = vcombine.low %v2109_v12, %v4443_v1  ;;  %v3404_v36 = vrot.slane %v2073_v60, 9  ;;  %v1846_v12 = vld [vmem:[#allocation2 + $0x30] sm:$0xf] }
 0x148   : > { %3634 = vmatmul.mubr.msk.bf16.gmra.mxu1 %vm1375_vm0, %v3766_v54  ;;  %v2120_v38 = vrot.slane %v4430_v50, 5  ;;  %v1881_v17 = vshrl.u32 %v1840_v11, 16  ;;  %v1864_v39 = vrot.slane %v1862_v5, 5  ;;  %v1873_v43 = vor.u32 %v1872_v21, %v1869_v13 }
 0x149   : > { %3620 = vmatmul.mubr.msk.bf16.vlgmr.msra.gmra.mxu0 %vm1375_vm0, %v3372_v2  ;;  %3649 = vmatprep.mubr.msk.bf16.mxu1 %vm1375_vm0, %v3406_v34  ;;  %v1860_v31 = vrot.slane %v1859_v20, 4  ;;  %v1884_v57 = vshll.u32 %v1840_v11, 16  ;;  %v1878_v15 = vrot.slane %v1876_v3, 5  ;;  %v1890_v44 = vshll.u32 %v4364_v6, 16  ;;  %v4472_v2 = vld [vmem:[#allocation2 + $0x14] sm:$0x1] }
 0x14a   : > { %3638 = vmatpush3.bf16.msra.mxu0 %v4190_v18  ;;  %3623 = vmatprep.mubr.msk.bf16.mxu0 %vm1375_vm0, %v3373_v45  ;;  %v1883_v55 = vrot.slane %v1881_v17, 4  ;;  %v1895_v49 = vshrl.u32 %v1842_v30, 16  ;;  %v1874_v56 = vrot.slane %v1873_v43, 4  ;;  %v4464_v0 = vsel %vm4332_vm8, %v3403_v4, %v2116_v48  ;;  %v2345_v34 = vld [vmem:[#allocation2 + $0x18] sm:$0xf] }
 0x14b   : > { %v4468_v61 = vsel %vm4332_vm8, %v3404_v36, %v2120_v38  ;;  %3697 = vmatprep.subr.msk.bf16.mxu0 %vm1388_vm6, %v4175_v10  ;;  %v1886_v18 = vrot.slane %v1884_v57, 5  ;;  %v1865_v6 = vsel %vm3982_vm3, %v1860_v31, %v1864_v39  ;;  %v1898_v8 = vshll.u32 %v1842_v30, 16  ;;  %v1844_v10 = vld [vmem:[#allocation2 + $0x28] sm:$0xf]  ;;  %v2347_v48 = vld [vmem:[#allocation2 + $0x20] sm:$0xf] }
 0x14c   : > { %v1897_v45 = vrot.slane %v1895_v49, 4  ;;  %v1904_v9 = vshll.u32 %v4372_v47, 16  ;;  %v1879_v51 = vsel %vm3982_vm3, %v1874_v56, %v1878_v15  ;;  %v2360_v26 = vshrl.u32 %v2343_v41, 16  ;;  %v4501_v56 = vld [vmem:[#allocation2 + $0x24] sm:$0x1] }
 0x14d   : > { %v1887_v53 = vor.u32 %v1886_v18, %v1883_v55  ;;  %v2363_v27 = vshll.u32 %v2343_v41, 16  ;;  %v3409_v63 = vcombine.low %v4464_v0, %v4468_v61  ;;  %v1892_v5 = vrot.slane %v1890_v44, 5 }
 0x14e   : > { %v1900_v58 = vrot.slane %v1898_v8, 5  ;;  %v2369_v59 = vshll.u32 %v4472_v2, 16  ;;  %v3389_v60 = vcombine.low %v1865_v6, %v1879_v51  ;;  %v2362_v1 = vrot.slane %v2360_v26, 4  ;;  %v4506_v6 = vld [vmem:[%s4869_s3 + $0x20] sm:$0xf] }
 0x14f   : > { %v2365_v29 = vrot.slane %v2363_v27, 5  ;;  %v2374_v47 = vshrl.u32 %v2345_v34, 16  ;;  %v1888_v62 = vrot.slane %v1887_v53, 4  ;;  %v1906_v11 = vrot.slane %v1904_v9, 5  ;;  %v1848_v53 = vld [vmem:[#allocation2 + $0x38] sm:$0xf] }
 0x150   : > { %3650 = vmatmul.mubr.msk.bf16.vlgmr.msra.gmra.mxu1 %vm1375_vm0, %v3407_v23  ;;  %v1901_v16 = vor.u32 %v1900_v58, %v1897_v45  ;;  %v2377_v54 = vshll.u32 %v2345_v34, 16  ;;  %v2383_v20 = vshll.u32 %v4477_v22, 16  ;;  %v1909_v21 = vshrl.u32 %v1844_v10, 16  ;;  %v1850_v58 = vld [vmem:[#allocation2 + $0x40] sm:$0xf] }
 0x151   : > { %3624 = vmatmul.mubr.msk.bf16.gmra.mxu0 %vm1375_vm0, %v3374_v7  ;;  %3653 = vmatprep.mubr.msk.bf16.mxu1 %vm1375_vm0, %v3408_v35  ;;  %v2366_v13 = vor.u32 %v2365_v29, %v2362_v1  ;;  %v2376_v3 = vrot.slane %v2374_v47, 4  ;;  %v2371_v46 = vrot.slane %v2369_v59, 5  ;;  %v1912_v23 = vshll.u32 %v1844_v10, 16  ;;  %v2349_v35 = vld [vmem:[#allocation2 + $0x28] sm:$0xf] }
 0x152   : > { %3639 = vmatprep.mubr.msk.bf16.mxu0 %vm1375_vm0, %v3389_v60  ;;  %v1902_v4 = vrot.slane %v1901_v16, 4  ;;  %v2379_v24 = vrot.slane %v2377_v54, 5  ;;  %3668 = vmatpush3.bf16.msra.mxu1 %v4204_v33  ;;  %v1911_v36 = vrot.slane %v1909_v21, 4  ;;  %v1918_v7 = vshll.u32 %v4393_v28, 16 }
 0x153   : > { %v2367_v30 = vrot.slane %v2366_v13, 4  ;;  %v1923_v38 = vshrl.u32 %v1846_v12, 16  ;;  %v1914_v39 = vrot.slane %v1912_v23, 5  ;;  %v1926_v43 = vshll.u32 %v1846_v12, 16  ;;  %v2351_v13 = vld [vmem:[#allocation2 + $0x30] sm:$0xf] }
 0x154   : > { %v1907_v17 = vsel %vm3982_vm3, %v1902_v4, %v1906_v11  ;;  %v2380_v31 = vor.u32 %v2379_v24, %v2376_v3  ;;  %v1893_v57 = vsel %vm3982_vm3, %v1888_v62, %v1892_v5  ;;  %v2385_v33 = vrot.slane %v2383_v20, 5 }
 0x155   : > { %v2372_v15 = vsel %vm3982_vm3, %v2367_v30, %v2371_v46  ;;  %v1925_v55 = vrot.slane %v1923_v38, 4  ;;  %v1915_v49 = vor.u32 %v1914_v39, %v1911_v36  ;;  %v1928_v41 = vrot.slane %v1926_v43, 5  ;;  %v2353_v30 = vld [vmem:[#allocation2 + $0x38] sm:$0xf] }
 0x156   : > { %v2381_v44 = vrot.slane %v2380_v31, 4  ;;  %v1932_v28 = vshll.u32 %v4406_v19, 16  ;;  %v3390_v0 = vcombine.low %v1893_v57, %v1907_v17  ;;  %v2388_v61 = vshrl.u32 %v2347_v48, 16  ;;  %v4511_v19 = vld [vmem:[#allocation2 + $0x2c] sm:$0x1] }
 0x157   : > { %v2391_v18 = vshll.u32 %v2347_v48, 16  ;;  %v2402_v34 = vshrl.u32 %v2349_v35, 16  ;;  %v1916_v8 = vrot.slane %v1915_v49, 4  ;;  %v1920_v9 = vrot.slane %v1918_v7, 5  ;;  %v4537_v49 = vld [vmem:[#allocation2 + $0x3c] sm:$0x1] }
 0x158   : > { %3654 = vmatmul.mubr.msk.bf16.gmra.mxu1 %vm1375_vm0, %v3409_v63  ;;  %v2386_v45 = vsel %vm3982_vm3, %v2381_v44, %v2385_v33  ;;  %v1929_v51 = vor.u32 %v1928_v41, %v1925_v55  ;;  %v2390_v27 = vrot.slane %v2388_v61, 4  ;;  %v2397_v5 = vshll.u32 %v4501_v56, 16  ;;  %v2355_v33 = vld [vmem:[#allocation2 + $0x40] sm:$0xf] }
 0x159   : > { %3640 = vmatmul.mubr.msk.bf16.vlgmr.msra.gmra.mxu0 %vm1375_vm0, %v3390_v0  ;;  %v3424_v26 = vcombine.low %v2372_v15, %v2386_v45  ;;  %v2393_v10 = vrot.slane %v2391_v18, 5  ;;  %v1934_v59 = vrot.slane %v1932_v28, 5  ;;  %v2404_v60 = vrot.slane %v2402_v34, 4 }
 0x15a   : > { %3658 = vmatpush3.bf16.msra.mxu0 %v4200_v25  ;;  %v1930_v63 = vrot.slane %v1929_v51, 4  ;;  %v2405_v1 = vshll.u32 %v2349_v35, 16  ;;  %v2411_v47 = vshll.u32 %v4511_v19, 16  ;;  %v1937_v62 = vshrl.u32 %v1848_v53, 16  ;;  %v4530_v35 = vld [vmem:[#allocation2 + $0x34] sm:$0x1] }
 0x15b   : > { %3669 = vmatprep.mubr.msk.bf16.mxu1 %vm1375_vm0, %v3424_v26  ;;  %v2394_v29 = vor.u32 %v2393_v10, %v2390_v27  ;;  %v1940_v16 = vshll.u32 %v1848_v53, 16  ;;  %3699 = vmatprep.subr.msk.bf16.mxu0 %vm1388_vm6, %v4506_v6  ;;  %v1921_v11 = vsel %vm3982_vm3, %v1916_v8, %v1920_v9  ;;  %v1951_v12 = vshrl.u32 %v1850_v58, 16  ;;  %v4540_v9 = vld [vmem:[#allocation2 + $0x44] sm:$0x1] }
 0x15c   : > { %v1935_v25 = vsel %vm3982_vm3, %v1930_v63, %v1934_v59  ;;  %v2407_v54 = vrot.slane %v2405_v1, 5  ;;  %v1939_v21 = vrot.slane %v1937_v62, 4  ;;  %v4526_v4 = vrot.slane %v2467_v42, 5 }
 0x15d   : > { %v3391_v3 = vcombine.low %v1921_v11, %v1935_v25  ;;  %v2395_v20 = vrot.slane %v2394_v29, 4  ;;  %v2399_v46 = vrot.slane %v2397_v5, 5  ;;  %v1942_v23 = vrot.slane %v1940_v16, 5 }
 0x15e   : > { %v2408_v24 = vor.u32 %v2407_v54, %v2404_v60  ;;  %v1946_v48 = vshll.u32 %v4423_v14, 16  ;;  %v2413_v36 = vrot.slane %v2411_v47, 5  ;;  %v1953_v7 = vrot.slane %v1951_v12, 4  ;;  %v3767_v54 = vld [vmem:[#allocation2 + $0x10] ss:$8 sps:$4 sm:$0xff]  }
 0x15f   : > { %3643 = vmatprep.mubr.msk.bf16.mxu0 %vm1375_vm0, %v3391_v3  ;;  %v1954_v38 = vshll.u32 %v1850_v58, 16  ;;  %v2416_v17 = vshrl.u32 %v2351_v13, 16  ;;  %v1943_v39 = vor.u32 %v1942_v23, %v1939_v21  ;;  %v1960_v37 = vshll.u32 %v4430_v50, 16 }
 0x160   : > { %v2409_v31 = vrot.slane %v2408_v24, 4  ;;  %v2419_v42 = vshll.u32 %v2351_v13, 16  ;;  %v2400_v43 = vsel %vm3982_vm3, %v2395_v20, %v2399_v46  ;;  %v2430_v14 = vshrl.u32 %v2353_v30, 16 }
 0x161   : > { %v1956_v57 = vrot.slane %v1954_v38, 5  ;;  %v2418_v15 = vrot.slane %v2416_v17, 4  ;;  %v1944_v44 = vrot.slane %v1943_v39, 4  ;;  %v2425_v28 = vshll.u32 %v4530_v35, 16  ;;  %v2574_v38 = vld [vmem:[#allocation2 + $0x18] sm:$0xe] }
 0x162   : > { %v2414_v55 = vsel %vm3982_vm3, %v2409_v31, %v2413_v36  ;;  %v2421_v41 = vrot.slane %v2419_v42, 5  ;;  %v2432_v50 = vrot.slane %v2430_v14, 4  ;;  %v2433_v18 = vshll.u32 %v2353_v30, 16  ;;  %v3768_v30 = vld [vmem:[#allocation2 + $0x20] ss:$8 sps:$4 sm:$0xff]  }
 0x163   : > { %v3425_v0 = vcombine.low %v2400_v43, %v2414_v55  ;;  %v1957_v61 = vor.u32 %v1956_v57, %v1953_v7  ;;  %v1948_v34 = vrot.slane %v1946_v48, 5  ;;  %v1962_v45 = vrot.slane %v1960_v37, 5  ;;  %v2573_v48 = vld [vmem:[#allocation2 + $0x10] sm:$0xe]  ;;  %v2576_v39 = vld [vmem:[#allocation2 + $0x28] sm:$0xe] }
 0x164   : > { %v2422_v8 = vor.u32 %v2421_v41, %v2418_v15  ;;  %v2444_v51 = vshrl.u32 %v2355_v33, 16  ;;  %v2435_v26 = vrot.slane %v2433_v18, 5  ;;  %v2439_v27 = vshll.u32 %v4537_v49, 16  ;;  %v3769_v7 = vld [vmem:[#allocation2 + $0x30] ss:$8 sps:$4 sm:$0xff]  }
 0x165   : > { %3670 = vmatmul.mubr.msk.bf16.vlgmr.msra.gmra.mxu1 %vm1375_vm0, %v3425_v0  ;;  %v1958_v53 = vrot.slane %v1957_v61, 4  ;;  %v2447_v10 = vshll.u32 %v2355_v33, 16  ;;  %v1949_v5 = vsel %vm3982_vm3, %v1944_v44, %v1948_v34  ;;  %v2427_v63 = vrot.slane %v2425_v28, 5  ;;  %v2577_v37 = vld [vmem:[#allocation2 + $0x30] sm:$0xe] }
 0x166   : > { %v2423_v58 = vrot.slane %v2422_v8, 4  ;;  %v2446_v59 = vrot.slane %v2444_v51, 4  ;;  %v2436_v1 = vor.u32 %v2435_v26, %v2432_v50  ;;  %v2453_v47 = vshll.u32 %v4540_v9, 16  ;;  %v3770_v42 = vld [vmem:[#allocation2 + $0x40] ss:$8 sps:$4 sm:$0xff]  }
 0x167   : > { %v1963_v60 = vsel %vm3982_vm3, %v1958_v53, %v1962_v45  ;;  %v2449_v29 = vrot.slane %v2447_v10, 5  ;;  %v2441_v25 = vrot.slane %v2439_v27, 5  ;;  %v2470_v21 = vsel %vm3982_vm3, %v4214_v52, %v4526_v4  ;;  %v2575_v43 = vld [vmem:[#allocation2 + $0x20] sm:$0xe]  ;;  %v2578_v14 = vld [vmem:[#allocation2 + $0x38] sm:$0xe] }
 0x168   : > { %v3392_v62 = vcombine.low %v1949_v5, %v1963_v60  ;;  %v2428_v16 = vsel %vm3982_vm3, %v2423_v58, %v2427_v63  ;;  %v2437_v11 = vrot.slane %v2436_v1, 4  ;;  %v2455_v20 = vrot.slane %v2453_v47, 5  ;;  %v2580_v61 = vld [vmem:[#allocation2 + $0x48] sm:$0xe]  ;;  %v2579_v50 = vld [vmem:[#allocation2 + $0x40] sm:$0xe] }
 0x169   : > { %v2450_v12 = vor.u32 %v2449_v29, %v2446_v59  ;;  %v2656_v36 = vsel %vm1388_vm6, %v4506_v6, 0  ;;  %v3432_v17 = vrot.slane %v2573_v48, 9  ;;  %v2599_v52 = vrot.slane %v4472_v2, 5  ;;  %v3771_v51 = vld [vmem:[#allocation2 + $0x4c] sm:$0x1] }
 0x16a   : > { %3644 = vmatmul.mubr.msk.bf16.gmra.mxu0 %vm1375_vm0, %v3392_v62  ;;  %v2442_v13 = vsel %vm3982_vm3, %v2437_v11, %v2441_v25  ;;  %v3433_v32 = vrot.slane %v2574_v38, 9  ;;  %v2603_v4 = vrot.slane %v4477_v22, 5  ;;  %v3435_v15 = vrot.slane %v2576_v39, 9 }
 0x16b   : > { %3659 = vmatprep.mubr.msk.bf16.mxu0 %vm1375_vm0, %v3767_v54  ;;  %v2451_v3 = vrot.slane %v2450_v12, 4  ;;  %v3426_v46 = vcombine.low %v2428_v16, %v2442_v13  ;;  %v2600_v31 = vsel %vm4332_vm8, %v3432_v17, %v2599_v52  ;;  %v2611_v2 = vrot.slane %v4511_v19, 5 }
 0x16c   : > { %v2604_v6 = vsel %vm4332_vm8, %v3433_v32, %v2603_v4  ;;  %v3436_v33 = vrot.slane %v2577_v37, 9  ;;  %v2615_v22 = vrot.slane %v4530_v35, 5  ;;  %v3434_v55 = vrot.slane %v2575_v43, 9 }
 0x16d   : > { %v2456_v24 = vsel %vm3982_vm3, %v2451_v3, %v2455_v20  ;;  %3673 = vmatprep.mubr.msk.bf16.mxu1 %vm1375_vm0, %v3426_v46  ;;  %v3441_v57 = vcombine.low %v2600_v31, %v2604_v6  ;;  %v2607_v44 = vrot.slane %v4501_v56, 5  ;;  %v3437_v41 = vrot.slane %v2578_v14, 9 }
 0x16e   : > { %v3427_v23 = vcombine.low %v2456_v24, %v2470_v21  ;;  %v2619_v28 = vrot.slane %v4537_v49, 5  ;;  %v2612_v0 = vsel %vm4332_vm8, %v3435_v15, %v2611_v2  ;;  %v2616_v19 = vsel %vm4332_vm8, %v3436_v33, %v2615_v22 }
 0x16f   : > { %v2608_v18 = vsel %vm4332_vm8, %v3434_v55, %v2607_v44  ;;  %v3439_v45 = vrot.slane %v2580_v61, 9  ;;  %v3438_v8 = vrot.slane %v2579_v50, 9  ;;  %v2623_v49 = vrot.slane %v4540_v9, 5 }
 0x170   : > { %3674 = vmatmul.mubr.msk.bf16.gmra.mxu1 %vm1375_vm0, %v3427_v23  ;;  %v3442_v35 = vcombine.low %v2608_v18, %v2612_v0  ;;  %v2620_v34 = vsel %vm4332_vm8, %v3437_v41, %v2619_v28  ;;  %v2627_v53 = vrot.slane %v3771_v51, 5  ;;  %vm2770_vm3 = vcmask 130048  }
 0x171   : > { %v3443_v56 = vcombine.low %v2616_v19, %v2620_v34  ;;  %v2624_v26 = vsel %vm4332_vm8, %v3438_v8, %v2623_v49  ;;  %vm2772_vm6 = vcmask 123904   ;;  %v3835_v5 = vmov 0.0  }
 0x172   : > { %3660 = vmatmul.mubr.msk.bf16.vlgmr.msra.gmra.mxu0 %vm1375_vm0, %v3768_v30  ;;  %v2628_v27 = vsel %vm4332_vm8, %v3439_v45, %v2627_v53  ;;  %2778 = vst.msk [vmem:[#allocation3 + $0x30] sm:$0xff] %vm2770_vm3, %v3835_v5  ;;  %2771 = vst.msk [vmem:[#allocation3] sm:$0xff] %vm2770_vm3, %v3835_v5  ;;  %vm3165_vm2 = vcmask 1041409   ;;  %vm3167_vm4 = vcmask 1042434   ;;  %vm3173_vm8 = vcmask 1045509  }
 0x173   : > { %3678 = vmatpush3.bf16.msra.mxu0 %v2656_v36  ;;  %3663 = vmatprep.mubr.msk.bf16.mxu0 %vm1375_vm0, %v3769_v7  ;;  %v3444_v10 = vcombine.low %v2624_v26, %v2628_v27  ;;  %2779 = vst.msk [vmem:[#allocation3 + $0x38] sm:$0x3] %vm2772_vm6, %v3835_v5  ;;  %2773 = vst.msk [vmem:[#allocation3 + $0x8] sm:$0x3] %vm2772_vm6, %v3835_v5 }
 0x174   : > { %2774 = vst.msk [vmem:[#allocation3 + $0x10] sm:$0xff] %vm2770_vm3, %v3835_v5  ;;  %2776 = vst.msk [vmem:[#allocation3 + $0x20] sm:$0xff] %vm2770_vm3, %v3835_v5 }
 0x175   : > { %2775 = vst.msk [vmem:[#allocation3 + $0x18] sm:$0x3] %vm2772_vm6, %v3835_v5  ;;  %2777 = vst.msk [vmem:[#allocation3 + $0x28] sm:$0x3] %vm2772_vm6, %v3835_v5 }
 0x176   : > { %2780 = vst.msk [vmem:[#allocation3 + $0x40] sm:$0xff] %vm2770_vm3, %v3835_v5  ;;  %2782 = vst.msk [vmem:[#allocation3 + $0x50] sm:$0xff] %vm2770_vm3, %v3835_v5 }
 0x177   : > { %2781 = vst.msk [vmem:[#allocation3 + $0x48] sm:$0x3] %vm2772_vm6, %v3835_v5  ;;  %2783 = vst.msk [vmem:[#allocation3 + $0x58] sm:$0x3] %vm2772_vm6, %v3835_v5 }
 0x178   : > { %2784 = vst.msk [vmem:[#allocation3 + $0x60] sm:$0xff] %vm2770_vm3, %v3835_v5  ;;  %2786 = vst.msk [vmem:[#allocation3 + $0x70] sm:$0xff] %vm2770_vm3, %v3835_v5 }
 0x179   : > { %2785 = vst.msk [vmem:[#allocation3 + $0x68] sm:$0x3] %vm2772_vm6, %v3835_v5  ;;  %2787 = vst.msk [vmem:[#allocation3 + $0x78] sm:$0x3] %vm2772_vm6, %v3835_v5 }
 0x17a   : > { %3664 = vmatmul.mubr.msk.bf16.gmra.mxu0 %vm1375_vm0, %v3770_v42  ;;  %2788 = vst.msk [vmem:[#allocation3 + $0x80] sm:$0xff] %vm2770_vm3, %v3835_v5  ;;  %2790 = vst.msk [vmem:[#allocation3 + $0x90] sm:$0xff] %vm2770_vm3, %v3835_v5 }
 0x17b   : > { %3679 = vmatprep.mubr.msk.bf16.mxu0 %vm1375_vm0, %v3441_v57  ;;  %2789 = vst.msk [vmem:[#allocation3 + $0x88] sm:$0x3] %vm2772_vm6, %v3835_v5  ;;  %2791 = vst.msk [vmem:[#allocation3 + $0x98] sm:$0x3] %vm2772_vm6, %v3835_v5  ;;  %vm3177_vm6 = vcmask 1047559  }
 0x182   : > { %3680 = vmatmul.mubr.msk.bf16.vlgmr.msra.gmra.mxu0 %vm1375_vm0, %v3442_v35 }
 0x183   : > { %3683 = vmatprep.mubr.msk.bf16.mxu0 %vm1375_vm0, %v3443_v56 }
 0x18a   : > { %3684 = vmatmul.mubr.msk.bf16.gmra.mxu0 %vm1375_vm0, %v3444_v10 }
 0x1ea   : > { %v3611_v40 = vpop.f32.mrf.mxu1 }
 0x1ec   : > { %v1526_v9 = vpop.f32.mrf.mxu1 }
 0x1ee   : > { %v3612_v58 = vpop.f32.mrf.mxu1 }
 0x1f0   : > { %v1529_v63 = vpop.f32.mrf.mxu1 }
 0x1f7   : > { %v3601_v59 = vpop.f32.mrf.mxu0 }
 0x1f8   : > { %v3615_v60 = vpop.f32.mrf.mxu1  ;;  %v1535_v28 = vadd.f32 %v3611_v40, %v3601_v59 }
 0x1f9   : > { %v1426_v1 = vpop.f32.mrf.mxu0 }
 0x1fa   : > { %v1542_v29 = vpop.f32.mrf.mxu1  ;;  %v1527_v19 = vadd.f32 %v1526_v9, %v1426_v1 }
 0x1fb   : > { %v3602_v47 = vpop.f32.mrf.mxu0 }
 0x1fc   : > { %v3616_v62 = vpop.f32.mrf.mxu1  ;;  %v1538_v35 = vadd.f32 %v3612_v58, %v3602_v47 }
 0x1fd   : > { %v1429_v16 = vpop.f32.mrf.mxu0 }
 0x1fe   : > { %v4615_v11 = vpop.f32.mrf.mxu1  ;;  %v1530_v51 = vadd.f32 %v1529_v63, %v1429_v16 }
 0x200   : > { %v3631_v25 = vpop.f32.mrf.mxu1 }
 0x201   : > { %v3605_v54 = vpop.f32.mrf.mxu0 }
 0x202   : > { %v1797_v12 = vpop.f32.mrf.mxu1  ;;  %v1551_v53 = vadd.f32 %v3615_v60, %v3605_v54 }
 0x203   : > { %v1442_v13 = vpop.f32.mrf.mxu0 }
 0x204   : > { %v3632_v3 = vpop.f32.mrf.mxu1  ;;  %v1543_v40 = vadd.f32 %v1542_v29, %v1442_v13 }
 0x205   : > { %v3606_v20 = vpop.f32.mrf.mxu0 }
 0x206   : > { %v1800_v21 = vpop.f32.mrf.mxu1  ;;  %v1554_v1 = vadd.f32 %v3616_v62, %v3606_v20 }
 0x207   : > { %v4617_v46 = vpop.f32.mrf.mxu0 }
 0x208   : > { %v3635_v24 = vpop.f32.mrf.mxu1  ;;  %v1546_v29 = vadd.f32 %v4615_v11, %v4617_v46  ;;  %v4640_v11 = vld [vmem:[%s4870_s4] ss:$0 sm:$0xff] }
 0x209   : > { %v3621_v23 = vpop.f32.mrf.mxu0 }
 0x20a   : > { %v4619_v48 = vpop.f32.mrf.mxu1  ;;  %v1712_v50 = vadd.f32 %v3621_v23, %v1535_v28 }
 0x20b   : > { %v1679_v30 = vpop.f32.mrf.mxu0 }
 0x20c   : > { %v4621_v36 = vpop.f32.mrf.mxu1  ;;  %v1710_v34 = vadd.f32 %v1679_v30, %v1527_v19  ;;  %v1830_v49 = vadd.f32 %v3631_v25, %v1712_v50  ;;  %v4648_v19 = vld [vmem:[%s4871_s5] ss:$0 sm:$0xff] }
 0x20d   : > { %v3622_v7 = vpop.f32.mrf.mxu0 }
 0x20e   : > { %v4623_v38 = vpop.f32.mrf.mxu1  ;;  %v1713_v8 = vadd.f32 %v3622_v7, %v1538_v35  ;;  %v1828_v10 = vadd.f32 %v1797_v12, %v1710_v34 }
 0x20f   : > { %v1682_v17 = vpop.f32.mrf.mxu0 }
 0x210   : > { %v3651_v32 = vpop.f32.mrf.mxu1  ;;  %v1711_v59 = vadd.f32 %v1682_v17, %v1530_v51  ;;  %v1831_v9 = vadd.f32 %v3632_v3, %v1713_v8  ;;  %v4656_v51 = vld [vmem:[%s4871_s5 + $0x1] ss:$0 sm:$0xff] }
 0x211   : > { %v3625_v52 = vpop.f32.mrf.mxu0 }
 0x212   : > { %v2185_v39 = vpop.f32.mrf.mxu1  ;;  %v1829_v25 = vadd.f32 %v1800_v21, %v1711_v59 }
 0x213   : > { %v1695_v4 = vpop.f32.mrf.mxu0 }
 0x214   : > { %v3652_v6 = vpop.f32.mrf.mxu1  ;;  %v1714_v23 = vadd.f32 %v1695_v4, %v1543_v40 }
 0x215   : > { %v3626_v31 = vpop.f32.mrf.mxu0 }
 0x216   : > { %v2188_v57 = vpop.f32.mrf.mxu1  ;;  %v1717_v7 = vadd.f32 %v3626_v31, %v1554_v1  ;;  %v1832_v17 = vadd.f32 %v4619_v48, %v1714_v23 }
 0x217   : > { %v1698_v37 = vpop.f32.mrf.mxu0 }
 0x218   : > { %v3655_v2 = vpop.f32.mrf.mxu1  ;;  %v1715_v4 = vadd.f32 %v1698_v37, %v1546_v29 }
 0x219   : > { %v3641_v42 = vpop.f32.mrf.mxu0 }
 0x21a   : > { %v4625_v33 = vpop.f32.mrf.mxu1  ;;  %v2060_v27 = vadd.f32 %v3641_v42, %v1830_v49  ;;  %v1833_v37 = vadd.f32 %v4623_v38, %v1715_v4  ;;  %v2824_v49 = vld [vmem:[#allocation3 + $0x1] sm:$0xff] }
 0x21b   : > { %v2027_v43 = vpop.f32.mrf.mxu0 }
 0x21c   : > { %v4627_v55 = vpop.f32.mrf.mxu1  ;;  %v2218_v28 = vadd.f32 %v3651_v32, %v2060_v27  ;;  %v1835_v32 = vadd.f32 %v4621_v36, %v1717_v7 }
 0x21d   : > { %v3642_v15 = vpop.f32.mrf.mxu0  ;;  %4884 = vst [vmem:[#allocation8_spill] sm:$0xff] %v4627_v55 }
 0x21e   : > { %v4629_v0 = vpop.f32.mrf.mxu1  ;;  %v2061_v47 = vadd.f32 %v3642_v15, %v1831_v9 }
 0x21f   : > { %v2030_v14 = vpop.f32.mrf.mxu0  ;;  %4885 = vst [vmem:[#allocation9_spill] sm:$0xff] %v4629_v0  ;;  %v1716_v0 = vadd.f32 %v3625_v52, %v1551_v53 }
 0x220   : > { %v2059_v12 = vadd.f32 %v2030_v14, %v1829_v25  ;;  %v2219_v52 = vadd.f32 %v3652_v6, %v2061_v47 }
 0x221   : > { %v1834_v63 = vadd.f32 %v3635_v24, %v1716_v0 }
 0x224   : > { %v4888_v34 = vld [vmem:[#allocation8_spill] sm:$0xff] }
 0x225   : > { %v3671_v45 = vpop.f32.mrf.mxu1 }
 0x226   : > { %v4889_v1 = vld [vmem:[#allocation9_spill] sm:$0xff] }
 0x227   : > { %v2534_v5 = vpop.f32.mrf.mxu1 }
 0x229   : > { %v3672_v30 = vpop.f32.mrf.mxu1 }
 0x22a   : > { %v3645_v22 = vpop.f32.mrf.mxu0 }
 0x22b   : > { %v2064_v13 = vadd.f32 %v3645_v22, %v1834_v63  ;;  %v2537_v62 = vpop.f32.mrf.mxu1 }
 0x22c   : > { %v2043_v44 = vpop.f32.mrf.mxu0 }
 0x22d   : > { %v2062_v42 = vadd.f32 %v2043_v44, %v1832_v17  ;;  %v2222_v15 = vadd.f32 %v3655_v2, %v2064_v13 }
 0x22e   : > { %v3646_v41 = vpop.f32.mrf.mxu0 }
 0x22f   : > { %v2220_v36 = vadd.f32 %v4625_v33, %v2062_v42 }
 0x230   : > { %v4631_v61 = vpop.f32.mrf.mxu0  ;;  %v3675_v46 = vpop.f32.mrf.mxu1 }
 0x231   : > { %4886 = vst [vmem:[#allocation10_spill] sm:$0xff] %v4631_v61  ;;  %v2058_v61 = vadd.f32 %v2027_v43, %v1828_v10  ;;  %v2065_v43 = vadd.f32 %v3646_v41, %v1835_v32 }
 0x232   : > { %v3661_v18 = vpop.f32.mrf.mxu0 }
 0x233   : > { %v2337_v16 = vadd.f32 %v3661_v18, %v2218_v28  ;;  %v2216_v54 = vadd.f32 %v2185_v39, %v2058_v61  ;;  %v2217_v39 = vadd.f32 %v2188_v57, %v2059_v12  ;;  %v2801_v61 = vld [vmem:[#allocation3] sm:$0xff]  ;;  %v2223_v38 = vadd.f32 %v4888_v34, %v2065_v43 }
 0x234   : > { %v2304_v56 = vpop.f32.mrf.mxu0  ;;  %v2840_v28 = vmul.f32 %v4656_v51, %v2824_v49 }
 0x235   : > { %v2335_v20 = vadd.f32 %v2304_v56, %v2216_v54  ;;  %v2567_v31 = vadd.f32 %v3671_v45, %v2337_v16  ;;  %v2550_v45 = vpop.f32.mrf.mxu1  ;;  %v2856_v16 = vld [vmem:[#allocation3 + $0x2] sm:$0xff]  ;;  %v4666_v54 = vld [vmem:[%s4871_s5 + $0x2] ss:$0 sm:$0xff] }
 0x236   : > { %v3662_v26 = vpop.f32.mrf.mxu0  ;;  %v2872_v32 = vmul.f32 %v4666_v54, %v2856_v16 }
 0x237   : > { %v2338_v24 = vadd.f32 %v3662_v26, %v2219_v52  ;;  %v2565_v14 = vadd.f32 %v2534_v5, %v2335_v20  ;;  %v2816_v5 = vmul.f32 %v4648_v19, %v2801_v61  ;;  %v3676_v7 = vpop.f32.mrf.mxu1 }
 0x238   : > { %v2307_v55 = vpop.f32.mrf.mxu0  ;;  %v4887_v50 = vld [vmem:[#allocation10_spill] sm:$0xff] }
 0x239   : > { %v2336_v6 = vadd.f32 %v2307_v55, %v2217_v39  ;;  %v2568_v2 = vadd.f32 %v3672_v30, %v2338_v24  ;;  %v2063_v18 = vadd.f32 %v4887_v50, %v1833_v37  ;;  %v2848_v42 = vadd.f32 %v2840_v28, %v2816_v5  ;;  %v2553_v24 = vpop.f32.mrf.mxu1  ;;  %v4721_v28 = vld [vmem:[%s4871_s5 + $0x6] ss:$0 sm:$0xff] }
 0x23a   : > { %v3665_v58 = vpop.f32.mrf.mxu0 }
 0x23b   : > { %v2341_v22 = vadd.f32 %v3665_v58, %v2222_v15  ;;  %v2566_v26 = vadd.f32 %v2537_v62, %v2336_v6  ;;  %v2221_v23 = vadd.f32 %v4889_v1, %v2063_v18 }
 0x23c   : > { %v2320_v60 = vpop.f32.mrf.mxu0 }
 0x23d   : > { %v2339_v35 = vadd.f32 %v2320_v60, %v2220_v36  ;;  %v2571_v10 = vadd.f32 %v3675_v46, %v2341_v22 }
 0x23e   : > { %v3666_v3 = vpop.f32.mrf.mxu0 }
 0x23f   : > { %v2342_v53 = vadd.f32 %v3666_v3, %v2223_v38  ;;  %v2569_v30 = vadd.f32 %v2550_v45, %v2339_v35 }
 0x240   : > { %v2323_v21 = vpop.f32.mrf.mxu0 }
 0x241   : > { %v2340_v29 = vadd.f32 %v2323_v21, %v2221_v23  ;;  %v2572_v20 = vadd.f32 %v3676_v7, %v2342_v53 }
 0x242   : > { %v3681_v0 = vpop.f32.mrf.mxu0 }
 0x243   : > { %v2725_v48 = vadd.f32 %v3681_v0, %v2567_v31  ;;  %v2570_v15 = vadd.f32 %v2553_v24, %v2340_v29 }
 0x244   : > { %v2692_v44 = vpop.f32.mrf.mxu0 }
 0x245   : > { %v2740_v41 = vadd.f32 %v4640_v11, %v2725_v48  ;;  %v2723_v57 = vadd.f32 %v2692_v44, %v2565_v14  ;;  %v2880_v44 = vadd.f32 %v2872_v32, %v2848_v42 }
 0x246   : > { %v3682_v55 = vpop.f32.mrf.mxu0 }
 0x247   : > { %vm2748_vm9 = vcmp.ge.f32.partialorder %v2740_v41, 0.0  ;;  %v2756_v33 = vmul.f32 0.1, %v2740_v41  ;;  %v2738_v56 = vadd.f32 %v4640_v11, %v2723_v57  ;;  %v2726_v8 = vadd.f32 %v3682_v55, %v2568_v2  ;;  %v4691_v57 = vld [vmem:[%s4871_s5 + $0x4] ss:$0 sm:$0xff] }
 0x248   : > { %v2695_v27 = vpop.f32.mrf.mxu0 }
 0x249   : > { %v2764_v40 = vsel %vm2748_vm9, %v2740_v41, %v2756_v33  ;;  %vm2746_vm10 = vcmp.ge.f32.partialorder %v2738_v56, 0.0  ;;  %v2754_v59 = vmul.f32 0.1, %v2738_v56  ;;  %v2741_v9 = vadd.f32 %v4640_v11, %v2726_v8  ;;  %v4686_v41 = vld [vmem:[%s4871_s5 + $0x3] ss:$0 sm:$0xff] }
 0x24a   : > { %2795 = vst.msk [vmem:[#allocation3 + $0x31] sm:$0xff] %vm2770_vm3, %v2764_v40  ;;  %v2724_v58 = vadd.f32 %v2695_v27, %v2566_v26  ;;  %v3685_v47 = vpop.f32.mrf.mxu0 }
 0x24b   : > { %v2762_v25 = vsel %vm2746_vm10, %v2738_v56, %v2754_v59  ;;  %vm2749_vm11 = vcmp.ge.f32.partialorder %v2741_v9, 0.0  ;;  %v2757_v63 = vmul.f32 0.1, %v2741_v9  ;;  %v2729_v60 = vadd.f32 %v3685_v47, %v2571_v10  ;;  %v4715_v59 = vld [vmem:[%s4871_s5 + $0x5] ss:$0 sm:$0xff] }
 0x24c   : > { %2793 = vst.msk [vmem:[#allocation3 + $0x11] sm:$0xff] %vm2770_vm3, %v2762_v25  ;;  %v2739_v12 = vadd.f32 %v4640_v11, %v2724_v58  ;;  %v2708_v13 = vpop.f32.mrf.mxu0 }
 0x24d   : > { %v2765_v17 = vsel %vm2749_vm11, %v2741_v9, %v2757_v63  ;;  %v2744_v3 = vadd.f32 %v4640_v11, %v2729_v60  ;;  %v2727_v62 = vadd.f32 %v2708_v13, %v2569_v30  ;;  %v4730_v60 = vld [vmem:[%s4871_s5 + $0x7] ss:$0 sm:$0xff] }
 0x24e   : > { %2796 = vst.msk [vmem:[#allocation3 + $0x41] sm:$0xff] %vm2770_vm3, %v2765_v17  ;;  %vm2747_vm12 = vcmp.ge.f32.partialorder %v2739_v12, 0.0  ;;  %v2755_v52 = vmul.f32 0.1, %v2739_v12  ;;  %v3686_v4 = vpop.f32.mrf.mxu0 }
 0x24f   : > { %vm2752_vm13 = vcmp.ge.f32.partialorder %v2744_v3, 0.0  ;;  %v2760_v21 = vmul.f32 0.1, %v2744_v3  ;;  %v2742_v31 = vadd.f32 %v4640_v11, %v2727_v62  ;;  %v2730_v43 = vadd.f32 %v3686_v4, %v2572_v20 }
 0x250   : > { %v2763_v39 = vsel %vm2747_vm12, %v2739_v12, %v2755_v52  ;;  %v2711_v0 = vpop.f32.mrf.mxu0 }
 0x251   : > { %2794 = vst.msk [vmem:[#allocation3 + $0x21] sm:$0xff] %vm2770_vm3, %v2763_v39  ;;  %v2768_v46 = vsel %vm2752_vm13, %v2744_v3, %v2760_v21  ;;  %vm2750_vm14 = vcmp.ge.f32.partialorder %v2742_v31, 0.0  ;;  %v2758_v48 = vmul.f32 0.1, %v2742_v31  ;;  %v2745_v14 = vadd.f32 %v4640_v11, %v2730_v43  ;;  %v4676_v37 = vld [vmem:[#allocation3 + $0x30] sm:$0xff] }
 0x252   : > { %v4678_v6 = vld [vmem:[#allocation3 + $0x31] sm:$0xff]  ;;  %2799 = vst.msk [vmem:[#allocation3 + $0x71] sm:$0xff] %vm2770_vm3, %v2768_v46  ;;  %v2728_v36 = vadd.f32 %v2711_v0, %v2570_v15  ;;  %v2819_v2 = vmul.f32 %v4648_v19, %v4676_v37  ;;  %v3002_v32 = vmul.f32 %v4721_v28, %v4676_v37 }
 0x253   : > { %v4680_v22 = vld [vmem:[#allocation3 + $0x32] sm:$0xff]  ;;  %v2843_v61 = vmul.f32 %v4656_v51, %v4678_v6  ;;  %v2766_v50 = vsel %vm2750_vm14, %v2742_v31, %v2758_v48  ;;  %vm2753_vm15 = vcmp.ge.f32.partialorder %v2745_v14, 0.0  ;;  %v2761_v18 = vmul.f32 0.1, %v2745_v14 }
 0x254   : > { %v2888_v35 = vld [vmem:[#allocation3 + $0x10] sm:$0xff]  ;;  %2797 = vst.msk [vmem:[#allocation3 + $0x51] sm:$0xff] %vm2770_vm3, %v2766_v50  ;;  %v2743_v38 = vadd.f32 %v4640_v11, %v2728_v36  ;;  %v2875_v33 = vmul.f32 %v4666_v54, %v4680_v22  ;;  %v3034_v39 = vmul.f32 %v4730_v60, %v4678_v6  ;;  %v4748_v15 = vld [vmem:[%s4871_s5 + $0x8] ss:$0 sm:$0xff] }
 0x255   : > { %v2920_v34 = vld [vmem:[#allocation3 + $0x11] sm:$0xff]  ;;  %v2904_v55 = vmul.f32 %v4686_v41, %v2888_v35  ;;  %v2769_v56 = vsel %vm2753_vm15, %v2745_v14, %v2761_v18  ;;  %v2851_v49 = vadd.f32 %v2843_v61, %v2819_v2  ;;  %v4703_v53 = vld [vmem:[#allocation3 + $0x40] sm:$0xff]  ;;  %v2817_v26 = vmul.f32 %v4648_v19, %v2888_v35 }
 0x256   : > { %v2936_v45 = vmul.f32 %v4691_v57, %v2920_v34  ;;  %v2952_v8 = vld [vmem:[#allocation3 + $0x12] sm:$0xff]  ;;  %v2841_v27 = vmul.f32 %v4656_v51, %v2920_v34  ;;  %2800 = vst.msk [vmem:[#allocation3 + $0x81] sm:$0xff] %vm2770_vm3, %v2769_v56  ;;  %vm2751_vm1 = vcmp.ge.f32.partialorder %v2743_v38, 0.0  ;;  %v2759_v11 = vmul.f32 0.1, %v2743_v38  ;;  %v4710_v40 = vld [vmem:[#allocation3 + $0x41] sm:$0xff] }
 0x257   : > { %v2912_v10 = vadd.f32 %v2904_v55, %v2880_v44  ;;  %v2907_v5 = vmul.f32 %v4686_v41, %v4703_v53  ;;  %v2883_v9 = vadd.f32 %v2875_v33, %v2851_v49  ;;  %v2968_v47 = vmul.f32 %v4715_v59, %v2952_v8  ;;  %v4723_v7 = vld [vmem:[#allocation3 + $0x42] sm:$0xff] }
 0x258   : > { %v2849_v1 = vadd.f32 %v2841_v27, %v2817_v26  ;;  %v2767_v23 = vsel %vm2751_vm1, %v2743_v38, %v2759_v11  ;;  %v2985_v30 = vld [vmem:[#allocation3 + $0x20] sm:$0xff]  ;;  %v2873_v25 = vmul.f32 %v4666_v54, %v2952_v8  ;;  %v2939_v29 = vmul.f32 %v4691_v57, %v4710_v40 }
 0x259   : > { %v2944_v58 = vadd.f32 %v2936_v45, %v2912_v10  ;;  %2798 = vst.msk [vmem:[#allocation3 + $0x61] sm:$0xff] %vm2770_vm3, %v2767_v23  ;;  %v3017_v63 = vld [vmem:[#allocation3 + $0x21] sm:$0xff]  ;;  %v2915_v16 = vadd.f32 %v2907_v5, %v2883_v9  ;;  %v3001_v13 = vmul.f32 %v4721_v28, %v2985_v30  ;;  %v2905_v3 = vmul.f32 %v4686_v41, %v2985_v30 }
 0x25a   : > { %v2881_v17 = vadd.f32 %v2873_v25, %v2849_v1  ;;  %v3049_v62 = vld [vmem:[#allocation3 + $0x22] sm:$0xff]  ;;  %v2971_v52 = vmul.f32 %v4715_v59, %v4723_v7  ;;  %v2818_v24 = vmul.f32 %v4648_v19, %v2985_v30  ;;  %v3033_v31 = vmul.f32 %v4730_v60, %v3017_v63 }
 0x25b   : > { %v2976_v12 = vadd.f32 %v2968_v47, %v2944_v58  ;;  %v2947_v20 = vadd.f32 %v2939_v29, %v2915_v16  ;;  %v2988_v4 = vld [vmem:[#allocation3 + $0x50] sm:$0xff]  ;;  %v2937_v14 = vmul.f32 %v4691_v57, %v3017_v63  ;;  %v2842_v36 = vmul.f32 %v4656_v51, %v3017_v63 }
 0x25c   : > { %v3020_v42 = vld [vmem:[#allocation3 + $0x51] sm:$0xff]  ;;  %v3004_v43 = vmul.f32 %v4721_v28, %v2988_v4  ;;  %v2913_v48 = vadd.f32 %v2905_v3, %v2881_v17  ;;  %v3065_v2 = vmul.f32 %v4748_v15, %v3049_v62  ;;  %v2969_v50 = vmul.f32 %v4715_v59, %v3049_v62 }
 0x25d   : > { %v3009_v21 = vadd.f32 %v3001_v13, %v2976_v12  ;;  %v2979_v0 = vadd.f32 %v2971_v52, %v2947_v20  ;;  %v3052_v46 = vld [vmem:[#allocation3 + $0x52] sm:$0xff]  ;;  %v3036_v61 = vmul.f32 %v4730_v60, %v3020_v42  ;;  %v2850_v34 = vadd.f32 %v2842_v36, %v2818_v24  ;;  %v2895_v36 = vld [vmem:[#allocation3 + $0x80] sm:$0xff] }
 0x25e   : > { %v2945_v35 = vadd.f32 %v2937_v14, %v2913_v48  ;;  %v2874_v38 = vmul.f32 %v4666_v54, %v3049_v62  ;;  %v3068_v45 = vmul.f32 %v4748_v15, %v3052_v46  ;;  %v2906_v33 = vmul.f32 %v4686_v41, %v4676_v37  ;;  %v3022_v24 = vld [vmem:[#allocation3 + $0x71] sm:$0xff] }
 0x25f   : > { %v3041_v44 = vadd.f32 %v3033_v31, %v3009_v21  ;;  %v3012_v18 = vadd.f32 %v3004_v43, %v2979_v0  ;;  %v2820_v56 = vmul.f32 %v4648_v19, %v4703_v53  ;;  %v2844_v27 = vmul.f32 %v4656_v51, %v4710_v40 }
 0x260   : > { %v2977_v49 = vadd.f32 %v2969_v50, %v2945_v35  ;;  %v2882_v26 = vadd.f32 %v2874_v38, %v2850_v34  ;;  %v2938_v10 = vmul.f32 %v4691_v57, %v4678_v6  ;;  %v2876_v5 = vmul.f32 %v4666_v54, %v4723_v7  ;;  %v2989_v29 = vld [vmem:[#allocation3 + $0x60] sm:$0xff] }
 0x261   : > { %v3073_v55 = vadd.f32 %v3065_v2, %v3041_v44  ;;  %v3044_v8 = vadd.f32 %v3036_v61, %v3012_v18  ;;  %v2908_v9 = vmul.f32 %v4686_v41, %v2988_v4  ;;  %v2852_v58 = vadd.f32 %v2844_v27, %v2820_v56  ;;  %v3021_v31 = vld [vmem:[#allocation3 + $0x61] sm:$0xff] }
 0x262   : > { %v3010_v1 = vadd.f32 %v3002_v32, %v2977_v49  ;;  %v2914_v23 = vadd.f32 %v2906_v33, %v2882_v26  ;;  %v3066_v47 = vmul.f32 %v4748_v15, %v4680_v22  ;;  %v2970_v30 = vmul.f32 %v4715_v59, %v4680_v22  ;;  %v2990_v32 = vld [vmem:[#allocation3 + $0x70] sm:$0xff]  ;;  %v3053_v18 = vld [vmem:[#allocation3 + $0x62] sm:$0xff] }
 0x263   : > { %v3081_v11 = vsel %vm2770_vm3, %v3073_v55, 0.0  ;;  %v3076_v37 = vadd.f32 %v3068_v45, %v3044_v8  ;;  %v2884_v16 = vadd.f32 %v2876_v5, %v2852_v58  ;;  %v3003_v12 = vmul.f32 %v4721_v28, %v4703_v53  ;;  %v2927_v49 = vld [vmem:[#allocation3 + $0x81] sm:$0xff] }
 0x264   : > { %3082 = vadd.xlane.f32.xlu0 %v3081_v11  ;;  %v3042_v63 = vadd.f32 %v3034_v39, %v3010_v1  ;;  %v2946_v6 = vadd.f32 %v2938_v10, %v2914_v23  ;;  %v3035_v13 = vmul.f32 %v4730_v60, %v4710_v40  ;;  %v2821_v17 = vmul.f32 %v4648_v19, %v2988_v4  ;;  %v3054_v39 = vld [vmem:[#allocation3 + $0x72] sm:$0xff]  ;;  %v2959_v23 = vld [vmem:[#allocation3 + $0x82] sm:$0xff] }
 0x265   : > { %v3090_v25 = vsel %vm2770_vm3, %v3076_v37, 0.0  ;;  %v2845_v3 = vmul.f32 %v4656_v51, %v3020_v42  ;;  %v2916_v22 = vadd.f32 %v2908_v9, %v2884_v16  ;;  %v2940_v52 = vmul.f32 %v4691_v57, %v3020_v42  ;;  %v2992_v9 = vld [vmem:[#allocation3 + $0x90] sm:$0xff] }
 0x266   : > { %3091 = vadd.xlane.f32.xlu1 %v3090_v25  ;;  %v3074_v62 = vadd.f32 %v3066_v47, %v3042_v63  ;;  %v2978_v20 = vadd.f32 %v2970_v30, %v2946_v6  ;;  %v3067_v21 = vmul.f32 %v4748_v15, %v4723_v7  ;;  %v2877_v53 = vmul.f32 %v4666_v54, %v3052_v46  ;;  %v3024_v16 = vld [vmem:[#allocation3 + $0x91] sm:$0xff] }
 0x267   : > { %v2853_v43 = vadd.f32 %v2845_v3, %v2821_v17  ;;  %v2909_v40 = vmul.f32 %v4686_v41, %v2989_v29  ;;  %v2948_v48 = vadd.f32 %v2940_v52, %v2916_v22  ;;  %v2972_v14 = vmul.f32 %v4715_v59, %v3052_v46 }
 0x268   : > { %v3084_v4 = vsel %vm2770_vm3, %v3074_v62, 0.0  ;;  %v3011_v0 = vadd.f32 %v3003_v12, %v2978_v20  ;;  %v3005_v42 = vmul.f32 %v4721_v28, %v2989_v29  ;;  %v2823_v7 = vmul.f32 %v4648_v19, %v2990_v32  ;;  %v3056_v20 = vld [vmem:[#allocation3 + $0x92] sm:$0xff] }
 0x269   : > { %3085 = vadd.xlane.f32.xlu0 %v3084_v4  ;;  %v2885_v44 = vadd.f32 %v2877_v53, %v2853_v43  ;;  %v2847_v2 = vmul.f32 %v4656_v51, %v3022_v24  ;;  %v2980_v50 = vadd.f32 %v2972_v14, %v2948_v48  ;;  %v2941_v35 = vmul.f32 %v4691_v57, %v3021_v31 }
 0x26a   : > { %v3043_v61 = vadd.f32 %v3035_v13, %v3011_v0  ;;  %v2879_v34 = vmul.f32 %v4666_v54, %v3054_v39  ;;  %v2911_v46 = vmul.f32 %v4686_v41, %v2895_v36  ;;  %v2822_v45 = vmul.f32 %v4648_v19, %v2989_v29 }
 0x26b   : > { %v2917_v38 = vadd.f32 %v2909_v40, %v2885_v44  ;;  %v2855_v55 = vadd.f32 %v2847_v2, %v2823_v7  ;;  %v3013_v56 = vadd.f32 %v3005_v42, %v2980_v50  ;;  %v3037_v8 = vmul.f32 %v4730_v60, %v3021_v31 }
 0x26c   : > { %v3075_v33 = vadd.f32 %v3067_v21, %v3043_v61  ;;  %v2846_v26 = vmul.f32 %v4656_v51, %v3021_v31  ;;  %v3069_v27 = vmul.f32 %v4748_v15, %v3053_v18  ;;  %v2973_v10 = vmul.f32 %v4715_v59, %v3053_v18 }
 0x26d   : > { %v2949_v11 = vadd.f32 %v2941_v35, %v2917_v38  ;;  %v2887_v5 = vadd.f32 %v2879_v34, %v2855_v55  ;;  %v3045_v1 = vadd.f32 %v3037_v8, %v3013_v56  ;;  %v2878_v19 = vmul.f32 %v4666_v54, %v3053_v18 }
 0x26e   : > { %v3087_v37 = vsel %vm2770_vm3, %v3075_v33, 0.0  ;;  %v2854_v58 = vadd.f32 %v2846_v26, %v2822_v45  ;;  %v3006_v30 = vmul.f32 %v4721_v28, %v2990_v32  ;;  %v2943_v51 = vmul.f32 %v4691_v57, %v2927_v49 }
 0x26f   : > { %3088 = vadd.xlane.f32.xlu1 %v3087_v37  ;;  %v2981_v47 = vadd.f32 %v2973_v10, %v2949_v11  ;;  %v2919_v25 = vadd.f32 %v2911_v46, %v2887_v5  ;;  %v3077_v63 = vadd.f32 %v3069_v27, %v3045_v1  ;;  %v3008_v6 = vmul.f32 %v4721_v28, %v2992_v9 }
 0x270   : > { %v2886_v29 = vadd.f32 %v2878_v19, %v2854_v58  ;;  %v2910_v12 = vmul.f32 %v4686_v41, %v2990_v32  ;;  %v3038_v17 = vmul.f32 %v4730_v60, %v3022_v24  ;;  %v2975_v54 = vmul.f32 %v4715_v59, %v2959_v23 }
 0x271   : > { %v3014_v13 = vadd.f32 %v3006_v30, %v2981_v47  ;;  %v2951_v3 = vadd.f32 %v2943_v51, %v2919_v25  ;;  %v3093_v62 = vsel %vm2770_vm3, %v3077_v63, 0.0  ;;  %v2942_v52 = vmul.f32 %v4691_v57, %v3022_v24 }
 0x272   : > { %v2918_v22 = vadd.f32 %v2910_v12, %v2886_v29  ;;  %3094 = vadd.xlane.f32.xlu0 %v3093_v62  ;;  %v3070_v31 = vmul.f32 %v4748_v15, %v3054_v39  ;;  %v3040_v53 = vmul.f32 %v4730_v60, %v3024_v16  ;;  %v2974_v32 = vmul.f32 %v4715_v59, %v3054_v39 }
 0x273   : > { %v3046_v21 = vadd.f32 %v3038_v17, %v3014_v13  ;;  %v2983_v43 = vadd.f32 %v2975_v54, %v2951_v3  ;;  %v3072_v0 = vmul.f32 %v4748_v15, %v3056_v20  ;;  %v3007_v14 = vmul.f32 %v4721_v28, %v2895_v36  ;;  %v3467_v28 = vld [vmem:[#allocation4] ss:$0 sm:$0xff] }
 0x274   : > { %v2950_v41 = vadd.f32 %v2942_v52, %v2918_v22  ;;  %v3039_v44 = vmul.f32 %v4730_v60, %v2927_v49  ;;  %v3071_v61 = vmul.f32 %v4748_v15, %v2959_v23  ;;  %v3131_v34 = vlaneseq }
 0x275   : > { %v3078_v40 = vadd.f32 %v3070_v31, %v3046_v21  ;;  %v3016_v4 = vadd.f32 %v3008_v6, %v2983_v43 }
 0x276   : > { %v2982_v48 = vadd.f32 %v2974_v32, %v2950_v41  ;;  %v3132_v55 = vand.u32 127, %v3131_v34  ;;  %v3134_v46 = vshrl.u32 %v3131_v34, 7 }
 0x277   : > { %v3096_v42 = vsel %vm2770_vm3, %v3078_v40, 0.0  ;;  %v3048_v57 = vadd.f32 %v3040_v53, %v3016_v4 }
 0x278   : > { %3097 = vadd.xlane.f32.xlu1 %v3096_v42  ;;  %v3015_v24 = vadd.f32 %v3007_v14, %v2982_v48  ;;  %v3135_v33 = vsub.s32 %v3132_v55, %v3134_v46 }
 0x279   : > { %v3080_v7 = vadd.f32 %v3072_v0, %v3048_v57 }
 0x27a   : > { %v3047_v2 = vadd.f32 %v3039_v44, %v3015_v24 }
 0x27b   : > { %v3102_v59 = vsel %vm2770_vm3, %v3080_v7, 0.0 }
 0x27c   : > { %3103 = vadd.xlane.f32.xlu1 %v3102_v59  ;;  %v3079_v39 = vadd.f32 %v3071_v61, %v3047_v2 }
 0x27e   : > { %v3099_v50 = vsel %vm2770_vm3, %v3079_v39, 0.0  ;;  %vm3175_vm3 = vcmask 1046534  }
 0x27f   : > { %3100 = vadd.xlane.f32.xlu0 %v3099_v50 }
 0x295   : > { %3112 = vperm.xlu0 %3742, %v3467_v28  }
 0x2ed   : > { %v3083_v36 = vpop.xlane.xlu0 %3082 }
 0x2ef   : > { %v3092_v35 = vpop.xlane.xlu1 %3091 }
 0x2f2   : > { %v3086_v18 = vpop.xlane.xlu0 %3085 }
 0x2f8   : > { %v3089_v60 = vpop.xlane.xlu1 %3088 }
 0x2fb   : > { %v3095_v38 = vpop.xlane.xlu0 %3094 }
 0x301   : > { %v3098_v45 = vpop.xlane.xlu1 %3097 }
 0x305   : > { %v3104_v1 = vpop.xlane.xlu1 %3103 }
 0x308   : > { %v3101_v15 = vpop.xlane.xlu0 %3100 }
 0x310   : > { %v3113_v56 = vpop.permute.xlu0 %3112 }
 0x311   : > { %v3115_v8 = vadd.f32 %v3113_v56, %v3083_v36  ;;  %v3116_v49 = vadd.f32 %v3113_v56, %v3086_v18  ;;  %v3117_v26 = vadd.f32 %v3113_v56, %v3089_v60  ;;  %v3118_v27 = vadd.f32 %v3113_v56, %v3092_v35 }
 0x312   : > { %v3119_v11 = vadd.f32 %v3113_v56, %v3095_v38  ;;  %v3120_v10 = vadd.f32 %v3113_v56, %v3098_v45  ;;  %v3121_v23 = vadd.f32 %v3113_v56, %v3101_v15  ;;  %v3122_v19 = vadd.f32 %v3113_v56, %v3104_v1 }
 0x313   : > { %v3136_v5 = vrot.slane %v3115_v8, %v3135_v33  ;;  %v3140_v9 = vrot.slane %v3116_v49, %v3135_v33  ;;  %v3144_v37 = vrot.slane %v3117_v26, %v3135_v33  ;;  %v3148_v58 = vrot.slane %v3118_v27, %v3135_v33 }
 0x314   : > { %v3152_v30 = vrot.slane %v3119_v11, %v3135_v33  ;;  %v3156_v51 = vrot.slane %v3120_v10, %v3135_v33  ;;  %v3160_v6 = vrot.slane %v3121_v23, %v3135_v33  ;;  %v3164_v29 = vrot.slane %v3122_v19, %v3135_v33 }
 0x315   : > { %v3166_v47 = vsel %vm3165_vm2, %v3140_v9, %v3136_v5 }
 0x316   : > { %v3168_v25 = vsel %vm3167_vm4, %v3144_v37, %v3166_v47 }
 0x317   : > { %v3170_v63 = vsel %vm3169_vm5, %v3148_v58, %v3168_v25 }
 0x318   : > { %v3172_v16 = vsel %vm3171_vm7, %v3152_v30, %v3170_v63 }
 0x319   : > { %v3174_v12 = vsel %vm3173_vm8, %v3156_v51, %v3172_v16 }
 0x31a   : > { %v3176_v13 = vsel %vm3175_vm3, %v3160_v6, %v3174_v12 }
 0x31b   : > { %v3178_v17 = vsel %vm3177_vm6, %v3164_v29, %v3176_v13 }
 0x31c   : > { %3180 = vst.msk [vmem:[%s273_s18] sm:$0xff] %vm1375_vm0, %v3178_v17 }
 0x31d   : > { %3785 = shalt.err (!%p3782_p3)
}
 0x31e   : > { %s3786_s9 = scalar_lea.hbm %s4828_s22, 128  ;;  %s3790_s15 = scalar_lea.hbm %s4873_s7, 256 }
 0x31f   : > { %p3787_p4 = scmp.ne.s32.totalorder %s4828_s22, %s3786_s9  ;;  %p3791_p9 = scmp.lt.s32.totalorder %s4828_s22, %s4873_s7 }
 0x320   : > { %p3792_p10 = scmp.lt.s32.totalorder %s3790_s15, %s3786_s9 }
 0x321   : > { %p3788_p7 = pnand %p3787_p4, %p3918_p5 }
 0x322   : > { %p3793_p11 = por %p3792_p10, %p3791_p9 }
 0x323   : > { %p3789_p8 = pneg %p3788_p7 }
 0x325   : > { %p3794_p12 = pnand %p3793_p11, %p3789_p8 }
 0x327   : > { %3797 = shalt.err (!%p3794_p12)
}
 0x328   : > { %3701 = dma.vmem_to_hbm [thread:$0]  (%p3918_p5), %s3196_s19, 128, %s4828_s22, %s3182_s6  }
 0x329 PF: > { %p3707_p13 = scmp.ge.s32.totalorder %s3832_s29, 2  ;;  %s3207_s18 = sand.u32 1, %s3820_s26  }
 0x32a   : > { %s3208_s20 = scalar_lea.sflag [#allocation6], %s3207_s18 }
 0x32b   : > { %p3704_p0 = pnand %p3707_p13, %p3922_p6 }
 0x32d   : > { %p3705_p1 = pneg %p3704_p0 }
 0x32f   : > { %3815 = dma.done.wait (%p3705_p1), %s3208_s20, 128  }
 0x330   : > { %3817 = vsyncadd (%p3705_p1), %s3208_s20, 4294967168  ;;  %p19_p2 = scmp.ge.s32.totalorder %s3905_s8, 4   ;;  %s4890_s26 = smov %s3824_s27 }
 0x331   : > { %s4891_s27 = smov %s3828_s28  ;;  %s4892_s28 = smov %s3916_s11 }
 0x332   : > { %s4893_s29 = smov %s3905_s8  ;;  %21 = sbr.rel (!%p19_p2) target bundleno = 6 (0x6), region = 107 }
 0x337   :  { %3213 = vsyncpa [#allocation6], 1 }
 0x338   :  { %3215 = vsyncpa [#allocation6 + $0x1], 1 }

</bundles_post_ra>
